<compile_context>
chip_gen: v7x
topology: tpu7x:2x2x1
jax: 0.10.0
libtpu: 0.0.40
codegen_flags: <defaults>
</compile_context>

<pallas_src>
import math

import jax
import jax.numpy as jnp
from jax import lax
from jax.experimental import pallas as pl
from jax.experimental.pallas import tpu as pltpu


# --------------------------- tiled linear: y = x @ W + b ---------------------------

def _linear_kernel(x_ref, w_ref, b_ref, o_ref):
    acc = jnp.dot(x_ref[...], w_ref[...], preferred_element_type=jnp.float32)
    o_ref[...] = (acc + b_ref[...]).astype(o_ref.dtype)


def _pick_tile(n, candidates=(512, 256, 128)):
    for c in candidates:
        if n % c == 0:
            return c
    return n


def linear(x, w, b, *, out_dtype, tm=128, tn=None):
    """x: [B, S, Din] @ w: [Din, Dout] + b: [Dout] -> [B, S, Dout].

    Tiled over (M=B*S, Dout); the output (N) tile defaults to 512 (lane-dense, fills
    the 256-wide MXU on v6e/v7x).  Operands are expected pre-cast (bf16 on the fast
    path); accumulation is fp32.  K (Din) is left un-tiled (small here).
    # TODO(synk): large Din needs a K grid axis ('arbitrary') + fp32 VMEM accumulator;
    # ragged M / Dout need padding or a masked tail tile.
    """
    B, S, Din = x.shape
    Dout = w.shape[1]
    M = B * S
    tn = _pick_tile(Dout) if tn is None else tn
    assert M % tm == 0 and Dout % tn == 0, (
        f"demo linear expects M % {tm} == 0 and Dout % {tn} == 0; got M={M}, Dout={Dout}")
    x2 = x.reshape(M, Din)
    b2 = b.reshape(1, Dout)
    out = pl.pallas_call(
        _linear_kernel,
        out_shape=jax.ShapeDtypeStruct((M, Dout), out_dtype),
        grid=(M // tm, Dout // tn),
        in_specs=[
            pl.BlockSpec((tm, Din), lambda i, j: (i, 0)),   # row tile (constant along j)
            pl.BlockSpec((Din, tn), lambda i, j: (0, j)),   # weight column tile
            pl.BlockSpec((1, tn), lambda i, j: (0, j)),
        ],
        out_specs=pl.BlockSpec((tm, tn), lambda i, j: (i, j)),
        compiler_params=pltpu.CompilerParams(
            dimension_semantics=("parallel", "parallel")),
    )(x2, w, b2)
    return out.reshape(B, S, Dout)


# ------------------- fused relative attention (one (batch, head) per step) -------------------

def _rga_kernel(q_ref, k_ref, v_ref, e_ref, eb_ref, o_ref, *maybe_w):
    """One (batch, head) grid step.

    q_ref/k_ref/v_ref: (1, S, dh) head slices of the packed qkv activation
                       (q already carries 1/sqrt(dh), folded into w_qkv on the host).
    e_ref:   (1, S, dh) relative embedding rows for this head.
    eb_ref:  (1, 1, S)  relative attention bias for this head (pre-scaled by 1/sqrt(dh)).
    o_ref:   (1, S, dh) attention output tile (head-packed / lane-dense, feeds the fc).
    maybe_w: optional (1, 1, S, S) softmax-weights output.
    """
    f32 = jnp.float32
    S = q_ref.shape[1]

    q = q_ref[0]
    k = k_ref[0]
    v = v_ref[0]
    e = e_ref[0]

    # Merged QK^T / QE^T: one (S, 2S) MXU matmul (256-wide output fills the v6e/v7x MXU).
    ke = jnp.concatenate([k, e], axis=0)                                # (2S, dh)
    dn = (((1,), (1,)), ((), ()))                                       # contract last dims
    logits2 = lax.dot_general(q, ke, dn, preferred_element_type=f32)    # (S, 2S)
    qk = logits2[:, :S]
    qe = logits2[:, S:] + eb_ref[0].astype(f32)                         # bias added pre-skew

    # Music-Transformer skew: srel[i, j] = qe[i, (S-1-i+j) mod S] -- one strided XLU roll
    # (per-row rotation by i+1).  Wrapped entries (j > i) are garbage but are overwritten
    # by the causal -1e9 fill below.
    srel = pltpu.roll(qe, 1, 1, stride=1, stride_axis=0)

    # In-kernel causal mask (two iotas + compare is a handful of VPU ops; no HBM mask,
    # and no cross-step scratch needed which would be unsafe under megacore splitting).
    row = lax.broadcasted_iota(jnp.int32, (S, S), 0)
    col = lax.broadcasted_iota(jnp.int32, (S, S), 1)
    logits = jnp.where(col <= row, qk + srel, f32(-1e9))

    m = jnp.max(logits, axis=-1, keepdims=True)
    p = jnp.exp(logits - m)
    denom = jnp.sum(p, axis=-1, keepdims=True)
    wgt = p * pl.reciprocal(denom, approx=True)      # EUP slot; rows sum to ~1 (approx)
    if maybe_w:
        maybe_w[0][0, 0] = wgt.astype(maybe_w[0].dtype)

    attn = jnp.dot(wgt.astype(v.dtype), v, preferred_element_type=f32)  # (S, dh)
    o_ref[0] = attn.astype(o_ref.dtype)


def fused_attention(qkv, e_used, eb_used, *, h, dh, out_dtype,
                    return_weights=False, weights_dtype=None):
    B, S, threed = qkv.shape
    d = h * dh
    assert threed == 3 * d

    in_specs = [
        pl.BlockSpec((1, S, dh), lambda b, hh: (b, 0, hh)),           # q head
        pl.BlockSpec((1, S, dh), lambda b, hh: (b, 0, h + hh)),       # k head
        pl.BlockSpec((1, S, dh), lambda b, hh: (b, 0, 2 * h + hh)),   # v head
        pl.BlockSpec((1, S, dh), lambda b, hh: (hh, 0, 0)),           # E head
        pl.BlockSpec((1, 1, S), lambda b, hh: (hh, 0, 0)),            # Eb head
    ]
    if return_weights:
        wdt = out_dtype if weights_dtype is None else weights_dtype
        out_shape = (jax.ShapeDtypeStruct((B, S, d), out_dtype),
                     jax.ShapeDtypeStruct((B, h, S, S), wdt))
        out_specs = (pl.BlockSpec((1, S, dh), lambda b, hh: (b, 0, hh)),
                     pl.BlockSpec((1, 1, S, S), lambda b, hh: (b, hh, 0, 0)))
    else:
        out_shape = jax.ShapeDtypeStruct((B, S, d), out_dtype)
        out_specs = pl.BlockSpec((1, S, dh), lambda b, hh: (b, 0, hh))

    res = pl.pallas_call(
        _rga_kernel,
        out_shape=out_shape,
        grid=(B, h),
        in_specs=in_specs,
        out_specs=out_specs,
        compiler_params=pltpu.CompilerParams(
            dimension_semantics=("parallel", "parallel")),
    )(qkv, qkv, qkv, e_used, eb_used)

    if return_weights:
        out, w = res
        return out, w
    return res, None


# ----------------------------- forward wrapper --------------------------------

def relative_global_attention_forward(x, params, mask=None, *, h, max_seq,
                                       compute_dtype=jnp.bfloat16,
                                       return_weights=False):
    """Matches RelativeGlobalAttention.forward(x, mask) for bidirectional=False,
    rel_attn_bias=True, cache_enabled=False.  The causal mask (j > i) is generated
    inside the kernel; `mask` is accepted for API parity only.
    Returns (out, attention_weights); weights are None unless return_weights=True."""
    del mask  # TODO(synk): arbitrary (non-causal) masks would need plumbing into the kernel.
    B, S, d = x.shape
    dh = d // h
    scale = 1.0 / math.sqrt(dh)

    # Host-side one-time prep: fold 1/sqrt(dh) into the q-columns of the qkv projection
    # and into Eb, and pre-cast all MXU operands to the compute dtype (halves HBM reads
    # for the memory-bound linears; removes per-step casts from the attention kernel).
    col_scale = jnp.concatenate([jnp.full((d,), scale, jnp.float32),
                                 jnp.ones((2 * d,), jnp.float32)])
    w_qkv = (params["w_qkv"] * col_scale[None, :]).astype(compute_dtype)
    b_qkv = (params["b_qkv"] * col_scale).astype(jnp.float32)
    w_fc = params["w_fc"].astype(compute_dtype)
    b_fc = params["b_fc"].astype(jnp.float32)
    e_used = params["E"][:, max_seq - S:].astype(compute_dtype)                      # (h, S, dh)
    eb_used = (params["Eb"][0, :, :, max_seq - S:] * scale).astype(compute_dtype)    # (h, 1, S)

    # qkv projection -> packed [B, S, 3d]; heads are split by BlockSpecs in the attention call
    qkv = linear(x.astype(compute_dtype), w_qkv, b_qkv, out_dtype=compute_dtype)

    attn, weights = fused_attention(
        qkv, e_used, eb_used, h=h, dh=dh, out_dtype=compute_dtype,
        return_weights=return_weights)                  # attn: [B, S, d] head-packed

    out = linear(attn, w_fc, b_fc, out_dtype=jnp.float32)
    return out, weights


# ----------------------------- pure-JAX reference ------------------------------

def reference_forward(x, params, mask, *, h, max_seq):
    B, S, d = x.shape
    dh = d // h
    scale = 1.0 / math.sqrt(dh)
    qkv = x @ params["w_qkv"] + params["b_qkv"]
    qkv = qkv.reshape(B, S, 3, h, dh).transpose(2, 0, 3, 1, 4)
    q, k, v = qkv[0], qkv[1], qkv[2]
    e = params["E"][:, max_seq - S:]
    qe = jnp.einsum("bhsd,htd->bhst", q, e)
    qe = qe + params["Eb"][:, :, :, max_seq - S:]
    i = jnp.arange(S)[:, None]
    j = jnp.arange(S)[None, :]
    qe = qe * (j >= (S - 1 - i)).astype(qe.dtype)
    padded = jnp.pad(qe, ((0, 0), (0, 0), (0, 0), (1, 0)))
    srel = padded.reshape(B * h, S + 1, S)[:, 1:].reshape(B, h, S, S)
    logits = (jnp.einsum("bhsd,bhtd->bhst", q, k) + srel) * scale
    logits = jnp.where(mask[None, None], -1e9, logits)
    w = jax.nn.softmax(logits, axis=-1)
    attn = jnp.einsum("bhst,bhtd->bhsd", w, v)
    out = attn.transpose(0, 2, 1, 3).reshape(B, S, d)
    out = out @ params["w_fc"] + params["b_fc"]
    return out, w


# ----------------------------------- main --------------------------------------

if __name__ == "__main__":
    B, S, d, h, max_seq = 2, 128, 512, 4, 256
    dh = d // h

    key = jax.random.PRNGKey(0)
    k1, k2, k3, k4, k5, k6, k7 = jax.random.split(key, 7)
    params = {
        "w_qkv": jax.random.normal(k1, (d, 3 * d), jnp.float32) / math.sqrt(d),
        "b_qkv": jax.random.normal(k2, (3 * d,), jnp.float32) * 0.02,
        "w_fc":  jax.random.normal(k3, (d, d), jnp.float32) / math.sqrt(d),
        "b_fc":  jax.random.normal(k4, (d,), jnp.float32) * 0.02,
        "E":     jax.random.normal(k5, (h, max_seq, dh), jnp.float32),
        # module inits Eb to zeros; use small non-zero values so the bias path is exercised
        "Eb":    0.1 * jax.random.normal(k6, (1, h, 1, max_seq), jnp.float32),
    }
    x = jax.random.normal(k7, (B, S, d), jnp.float32)

    # causal mask (True = masked); only used by the reference — the kernel builds it itself
    mask = jnp.arange(S)[None, :] > jnp.arange(S)[:, None]

    ref_out, ref_w = reference_forward(x, params, mask, h=h, max_seq=max_seq)

    # 1) fp32 compute path with weights: tight check of the fused roll/mask/softmax logic
    out, weights = relative_global_attention_forward(
        x, params, mask, h=h, max_seq=max_seq,
        compute_dtype=jnp.float32, return_weights=True)
    out = jax.block_until_ready(out)
    weights = jax.block_until_ready(weights)
    assert out.shape == (B, S, d) and weights.shape == (B, h, S, S)
    assert jnp.allclose(weights, ref_w, atol=2e-2, rtol=2e-2), "fp32 attention weights mismatch"
    assert jnp.allclose(out, ref_out, atol=2e-2, rtol=2e-2), "fp32 output mismatch"

    # 2) bf16 MXU operands / bf16 weights output (looser tolerances)
    out_bf, weights_bf = relative_global_attention_forward(
        x, params, mask, h=h, max_seq=max_seq,
        compute_dtype=jnp.bfloat16, return_weights=True)
    out_bf = jax.block_until_ready(out_bf)
    weights_bf = jax.block_until_ready(weights_bf)
    assert jnp.allclose(weights_bf.astype(jnp.float32), ref_w, atol=5e-2, rtol=5e-2), \
        "bf16 attention weights mismatch"
    assert jnp.allclose(out_bf, ref_out, atol=1e-1, rtol=1e-1), "bf16 output mismatch"

    # 3) the default fast path: bf16, no attention-weights HBM writeback
    out_fast, w_none = relative_global_attention_forward(
        x, params, mask, h=h, max_seq=max_seq, compute_dtype=jnp.bfloat16)
    out_fast = jax.block_until_ready(out_fast)
    assert w_none is None
    assert jnp.allclose(out_fast, ref_out, atol=1e-1, rtol=1e-1), "fast-path output mismatch"

    print("KERNEL_OK")
</pallas_src>

<mosaic_0001>
module attributes {stable_mosaic.version = 11 : i64} {
  func.func @_linear_kernel(%arg0: i32, %arg1: i32, %arg2: memref<128x512xf32, #tpu.memory_space<vmem>>, %arg3: memref<512x512xf32, #tpu.memory_space<vmem>>, %arg4: memref<1x512xf32, #tpu.memory_space<vmem>>, %arg5: memref<128x512xf32, #tpu.memory_space<vmem>>) attributes {dimension_semantics = [#tpu.dimension_semantics<parallel>, #tpu.dimension_semantics<parallel>], iteration_bounds = array<i64: 2, 3>, scalar_prefetch = 0 : i64, scratch_operands = 0 : i64, tpu.core_type = #tpu.core_type<tc>, window_params = [{transform_indices = @transform_0, window_bounds = array<i64: 128, 512>}, {transform_indices = @transform_1, window_bounds = array<i64: 512, 512>}, {transform_indices = @transform_2, window_bounds = array<i64: 1, 512>}, {transform_indices = @transform_3, window_bounds = array<i64: 128, 512>}]} {
    %c0 = arith.constant 0 : index
    %c0_0 = arith.constant 0 : index
    %0 = vector.load %arg2[%c0, %c0_0] : memref<128x512xf32, #tpu.memory_space<vmem>>, vector<128x512xf32>
    %c0_1 = arith.constant 0 : index
    %c0_2 = arith.constant 0 : index
    %1 = vector.load %arg3[%c0_1, %c0_2] : memref<512x512xf32, #tpu.memory_space<vmem>>, vector<512x512xf32>
    %cst = arith.constant dense<0.000000e+00> : vector<128x512xf32>
    %2 = tpu.matmul %0, %1, %cst {dimension_numbers = #tpu.dot_dimension_numbers<[1], [0], [0], [1], [0, 0, 1, 1], [], []>} : vector<128x512xf32>, vector<512x512xf32>, vector<128x512xf32> -> vector<128x512xf32>
    %c0_3 = arith.constant 0 : index
    %c0_4 = arith.constant 0 : index
    %3 = vector.load %arg4[%c0_3, %c0_4] : memref<1x512xf32, #tpu.memory_space<vmem>>, vector<1x512xf32>
    %4 = vector.broadcast %3 : vector<1x512xf32> to vector<128x512xf32>
    %5 = arith.addf %2, %4 : vector<128x512xf32>
    %c0_5 = arith.constant 0 : index
    %c0_6 = arith.constant 0 : index
    %6 = vector.load %arg5[%c0_5, %c0_6] : memref<128x512xf32, #tpu.memory_space<vmem>>, vector<128x512xf32>
    tpu.vector_store %arg5[%c0_5, %c0_6], %5 {strides = array<i32>} : memref<128x512xf32, #tpu.memory_space<vmem>>, vector<128x512xf32>,
    return
  }
  func.func @transform_0(%arg0: i32, %arg1: i32) -> (i32, i32) {
    %c0_i32 = arith.constant 0 : i32
    %c0_i32_0 = arith.constant 0 : i32
    return %arg0, %c0_i32 : i32, i32
  }
  func.func @transform_1(%arg0: i32, %arg1: i32) -> (i32, i32) {
    %c0_i32 = arith.constant 0 : i32
    %c0_i32_0 = arith.constant 0 : i32
    return %c0_i32, %arg1 : i32, i32
  }
  func.func @transform_2(%arg0: i32, %arg1: i32) -> (i32, i32) {
    %c0_i32 = arith.constant 0 : i32
    %c0_i32_0 = arith.constant 0 : i32
    return %c0_i32, %arg1 : i32, i32
  }
  func.func @transform_3(%arg0: i32, %arg1: i32) -> (i32, i32) {
    %c0_i32 = arith.constant 0 : i32
    return %arg0, %arg1 : i32, i32
  }
}

</mosaic_0001>

<bundles_post_ra>
// kernel: tpu_custom_call.1
= control target key start
LH: loop header
LB: loop body
LE: loop exit
PB: predicated region body
PF: predicated region fallthrough
CT: control target
= control target key end

     0   :  { %s3169_s0 = inlined_call_operand.hbm [shape: f32[256,512], index: 0, kind: input, shape index: {}]   ;;  %s3170_s1 = inlined_call_operand.hbm [shape: f32[512,1536], index: 1, kind: input, shape index: {}]   ;;  %s3171_s2 = inlined_call_operand.hbm [shape: f32[1,1536], index: 2, kind: input, shape index: {}]   ;;  %s3172_s3 = inlined_call_operand.hbm [shape: f32[256,1536], index: 3, kind: output, shape index: {}]  }
   0x1   :  { %3190 = sst [smem:[#allocation24_spill]] %s3170_s1 }
   0x2   :  { %3191 = sst [smem:[#allocation25_spill]] %s3172_s3 }
   0x3   :  { %8 = vsyncpa [#allocation3], 0 }
   0x4   :  { %10 = vsyncpa [#allocation3 + $0x1], 0 }
   0x5   :  { %11 = vsyncpa [#allocation6], 0 }
   0x6   :  { %13 = vsyncpa [#allocation6 + $0x1], 0 }
   0x7   :  { %14 = vsyncpa [#allocation4], 0 }
   0x8   :  { %16 = vsyncpa [#allocation4 + $0x1], 0  ;;  %s2310_s12 = smov 0   ;;  %s2312_s13 = smov 0  }
   0x9   :  { %s2314_s14 = smov 0   ;;  %s2316_s15 = smov 0  }
   0xa   :  { %s2318_s16 = smov 0   ;;  %s2320_s17 = smov 0  }
   0xb   :  { %s2322_s18 = smov 0   ;;  %s2324_s19 = smov 0  }
   0xc   :  { %s2326_s20 = smov 0   ;;  %s2328_s21 = smov 0  }
   0xd   :  { %s2330_s22 = smov 0   ;;  %s2332_s23 = smov 0  }
   0xe   :  { %s2334_s24 = smov 0   ;;  %s2336_s25 = smov 0  }
   0xf LB: > { %3192 = sst [smem:[#allocation12_spill]] %s2234_s14  ;;  %s31_s26 = sadd.s32 1, %s2270_s23  ;;  %s2278_s25 = sphi %s2336_s25, %s22_s25   ;;  %s2274_s24 = sphi %s2334_s24, %s3243_s24   ;;  %s2270_s23 = sphi %s2332_s23, %s3251_s23   ;;  %s2266_s22 = sphi %s2330_s22, %s3241_s22   ;;  %s2262_s21 = sphi %s2328_s21, %s3250_s21   ;;  %s2258_s20 = sphi %s2326_s20, %s3239_s20   ;;  %s2254_s19 = sphi %s2324_s19, %s3249_s19   ;;  %s2250_s18 = sphi %s2322_s18, %s3248_s18   ;;  %s2246_s17 = sphi %s2320_s17, %s3237_s17   ;;  %s2242_s16 = sphi %s2318_s16, %s3247_s16   ;;  %s2238_s15 = sphi %s2316_s15, %s3246_s15   ;;  %s2234_s14 = sphi %s2314_s14, %s3235_s14   ;;  %s2230_s13 = sphi %s2312_s13, %s3245_s13   ;;  %s2226_s12 = sphi %s2310_s12, %s3244_s12  }
  0x10   : > { %3193 = sst [smem:[#allocation13_spill]] %s2246_s17  ;;  %p3175_p0 = scmp.eq.s32.totalorder %s2278_s25, 0 }
  0x11   : > { %3194 = sst [smem:[#allocation14_spill]] %s2258_s20  ;;  %p2384_p1 = scmp.ge.s32.totalorder %s31_s26, 3 }
  0x12   : > { %3195 = sst [smem:[#allocation15_spill]] %s2262_s21  ;;  %p74_p2 = scmp.ne.s32.totalorder %s2246_s17, %s2242_s16 }
  0x13   : > { %3196 = sst [smem:[#allocation16_spill]] %s2266_s22  ;;  %p3174_p4 = scmp.lt.s32.totalorder %s2278_s25, 6 }
  0x14   : > { %3197 = sst [smem:[#allocation17_spill]] %s2270_s23  ;;  %p76_p5 = por %p74_p2, %p3175_p0 }
  0x15   : > { %3198 = sst [smem:[#allocation18_spill]] %s2274_s24  ;;  %s180_s29 = sand.u32 1, %s2278_s25  }
  0x16   : > { %s3173_s30 = sand.u32 1, %s2246_s17   ;;  %s1509_s5 = sshll.u32 %s2270_s23, 9 }
  0x17   : > { %s1489_s4 = sshll.u32 %s3173_s30, 11  ;;  %s3200_s1 = sld [smem:[#allocation24_spill]] }
  0x18   : > { %s184_s9 = scalar_lea.vmem [#allocation5], %s1489_s4  ;;  %p2408_p6 = pnand %p3174_p4, %p76_p5 }
  0x19   : > { %s191_s10 = sshll.u32 %s184_s9, 4  ;;  %s2415_s30 = scalar_lea.sflag [#allocation6], %s180_s29  ;;  %s2412_s10 = int_to_ptr.vmem [resolvable:$true] %s191_s10 }
  0x1a   : > { %p3186_p9 = pneg %p2408_p6 }
  0x1d   : > { %s2404_s8 = scalar_lea.hbm %s3200_s1, %s1509_s5  ;;  %s2043_s7 = scalar_lea.hbm %s3200_s1, 98304 }
  0x1e   : > { %s2038_s5 = scalar_lea.hbm %s2404_s8, 32768  ;;  %p2044_p12 = scmp.lt.u32.totalorder %s2404_s8, %s3200_s1 }
  0x1f   : > { %p2039_p8 = scmp.ne.s32.totalorder %s2404_s8, %s2038_s5  ;;  %p2045_p13 = scmp.lt.u32.totalorder %s2043_s7, %s2038_s5 }
  0x20   : > { %p2047_p5 = scmp.lt.u32.totalorder %s2038_s5, %s2404_s8 }
  0x21   : > { %p2041_p10 = pnand %p3186_p9, %p2039_p8  ;;  %p2046_p2 = por %p2045_p13, %p2044_p12 }
  0x23   : > { %p2042_p11 = pneg %p2041_p10  ;;  %p2048_p4 = por %p2047_p5, %p2046_p2 }
  0x25   : > { %p2049_p3 = pnand %p2048_p4, %p2042_p11 }
  0x27   : > { %2052 = shalt.err (!%p2049_p3)
}
  0x28   : > { %s2053_s29 = scalar_lea.vmem %s2412_s10, 32768  ;;  %s2280_s4 = smov [#allocation5]  }
  0x29   : > { %p2054_p8 = scmp.ne.s32.totalorder %s2412_s10, %s2053_s29  ;;  %s2058_s6 = sshll.u32 %s2280_s4, 4  ;;  %s2059_s6 = int_to_ptr.vmem [resolvable:$false] %s2058_s6 }
  0x2a   : > { %s2060_s28 = scalar_lea.vmem %s2059_s6, 65536  ;;  %p2061_p7 = scmp.lt.s32.totalorder %s2412_s10, %s2059_s6 }
  0x2b   : > { %p2056_p10 = pnand %p2054_p8, %p3186_p9  ;;  %p2062_p12 = scmp.lt.s32.totalorder %s2060_s28, %s2053_s29 }
  0x2d   : > { %p2057_p0 = pneg %p2056_p10  ;;  %p2063_p13 = por %p2062_p12, %p2061_p7 }
  0x2f   : > { %p2064_p2 = pnand %p2063_p13, %p2057_p0 }
  0x31   : > { %2067 = shalt.err (!%p2064_p2)
}
  0x32   : > { %s2281_s5 = smov 1536   ;;  %s3176_s7 = smov 512  }
  0x33   : > { %s3177_s9 = smov 32   ;;  %p218_p0 = scmp.lt.s32.totalorder %s2278_s25, 7 }
  0x34   : > { %1910 = dma.hbm_to_vmem [thread:$0]  (!%p2408_p6), %s2404_s8, 32768, %s2412_s10, %s2415_s30, %s2281_s5, %s3176_s7, %s3177_s9  }
  0x35   : > { %p3202_p3 = scmp.ge.s32.totalorder %s2278_s25, 1  ;;  %s2453_s4 = sadd.s32 4294967295, %s2278_s25  }
  0x36   : > { %s1482_s6 = sadd.s32 4294967294, %s2278_s25   ;;  %s3253_s26 = smov (%p2384_p1, %s31_s26), 0 }
  0x37   : > { %p2448_p4 = pnand %p3202_p3, %p218_p0  ;;  %3204 = sst [smem:[#allocation19_spill]] %s3253_s26 }
  0x38   : > { %s34_s28 = sadd.s32 1, %s2274_s24  ;;  %s41_s8 = sadd.s32 1, %s2258_s20 }
  0x39   : > { %s3203_s29 = scalar_select %p2448_p4, 1, 0 }
  0x3a   : > { %s3255_s28 = smov (!%p2384_p1, %s34_s28), %s2274_s24  ;;  %p48_p7 = scmp.ne.s32.totalorder %s2258_s20, %s2254_s19 }
  0x3b   : > { %p54_p11 = scmp.ne.s32.totalorder %s2254_s19, %s2250_s18  ;;  %p36_p5 = scmp.ge.s32.totalorder %s3255_s28, 2 }
  0x3c   : > { %p55_p8 = scmp.eq.s32.totalorder %s2453_s4, 0  ;;  %p3205_p10 = scmp.eq.s32.totalorder %s2278_s25, 0 }
  0x3d   : > { %s64_s5 = ssub.s32 %s2270_s23, %s3253_s26  ;;  %s3257_s28 = smov (%p36_p5, %s3255_s28), 0 }
  0x3e   : > { %p2474_p12 = por %p3205_p10, %p48_p7  ;;  %3207 = sst [smem:[#allocation20_spill]] %s3257_s28 }
  0x3f   : > { %p2482_p1 = por %p55_p8, %p54_p11  ;;  %p65_p13 = scmp.eq.s32.totalorder %s64_s5, 0 }
  0x40   : > { %s38_s18 = ssub.s32 %s2274_s24, %s3257_s28  ;;  %p3209_p2 = scmp.ne.s32.totalorder %s2242_s16, %s2238_s15 }
  0x41   : > { %s3208_s27 = scalar_select %p2482_p1, 1, 0 }
  0x42   : > { %p2491_p0 = por %p3209_p2, %p55_p8  ;;  %p39_p3 = scmp.eq.s32.totalorder %s38_s18, 0 }
  0x43   : > { %s118_s9 = sor.u32 %s64_s5, %s38_s18  ;;  %s3211_s1 = sadd.s32 1, %s2246_s17 }
  0x44   : > { %s3210_s7 = scalar_select %p2491_p0, 1, 0 }
  0x45   : > { %s2498_s26 = scalar_select %p65_p13, %s2246_s17, %s3211_s1  }
  0x46   : > { %s2501_s3 = scalar_select %p39_p3, %s2258_s20, %s41_s8  }
  0x47   : > { %3212 = sst [smem:[#allocation21_spill]] %s2498_s26  ;;  %p119_p7 = scmp.eq.s32.totalorder %s118_s9, 0 }
  0x48   : > { %3213 = sst [smem:[#allocation22_spill]] %s2501_s3  ;;  %s121_s21 = sadd.s32 1, %s2234_s14 }
  0x49   : > { %p131_p11 = scmp.ne.s32.totalorder %s2234_s14, %s2230_s13  ;;  %p132_p5 = scmp.eq.s32.totalorder %s2453_s4, 5 }
  0x4a   : > { %s2508_s15 = scalar_select %p119_p7, %s2234_s14, %s121_s21  }
  0x4b   : > { %p2510_p8 = por %p132_p5, %p131_p11  ;;  %p137_p10 = scmp.ne.s32.totalorder %s2230_s13, %s2226_s12 }
  0x4c   : > { %3214 = sst [smem:[#allocation23_spill]] %s2508_s15  ;;  %p138_p2 = scmp.eq.s32.totalorder %s1482_s6, 5 }
  0x4d   : > { %s3215_s28 = scalar_select %p2510_p8, 1, 0 }
  0x4e   : > { %s158_s1 = sand.u32 1, %s2258_s20   ;;  %p2517_p13 = por %p138_p2, %p137_p10 }
  0x4f   : > { %s1485_s5 = sshll.u32 %s158_s1, 9  ;;  %s1508_s9 = sshll.u32 %s2274_s24, 13 }
  0x50   : > { %s3216_s8 = scalar_select %p2517_p13, 1, 0 }
  0x51   : > { %s162_s18 = scalar_lea.vmem [#allocation2], %s1485_s5  ;;  %s2525_s21 = scalar_lea.hbm %s3169_s0, %s1508_s9 }
  0x52   : > { %s170_s3 = sshll.u32 %s162_s18, 4  ;;  %p3217_p3 = scmp.lt.s32.totalorder %s2278_s25, 6  ;;  %s2527_s3 = int_to_ptr.vmem [resolvable:$true] %s170_s3 }
  0x53   : > { %s3219_s24 = sand.u32 1, %s2246_s17   ;;  %s1510_s22 = sshll.u32 %s2270_s23, 6 }
  0x54   : > { %p2533_p7 = pnand %p3217_p3, %p2474_p12  ;;  %s2539_s5 = sshll.u32 %s3219_s24, 2 }
  0x55   : > { %s2545_s18 = scalar_lea.hbm %s3171_s2, %s1510_s22  ;;  %s2547_s20 = scalar_lea.sflag [#allocation3], %s158_s1 }
  0x56   : > { %s2068_s15 = scalar_lea.hbm %s2525_s21, 8192  ;;  %p2070_p12 = pneg %p2533_p7 }
  0x57   : > { %p2069_p11 = scmp.ne.s32.totalorder %s2525_s21, %s2068_s15  ;;  %s2073_s24 = scalar_lea.hbm %s3169_s0, 16384 }
  0x58   : > { %p2074_p2 = scmp.lt.u32.totalorder %s2525_s21, %s3169_s0  ;;  %p2075_p3 = scmp.lt.u32.totalorder %s2073_s24, %s2068_s15 }
  0x59   : > { %p2071_p5 = pnand %p2070_p12, %p2069_p11  ;;  %p2077_p13 = scmp.lt.u32.totalorder %s2068_s15, %s2525_s21 }
  0x5a   : > { %p2076_p9 = por %p2075_p3, %p2074_p2 }
  0x5b   : > { %p2072_p10 = pneg %p2071_p5 }
  0x5c   : > { %p2078_p8 = por %p2077_p13, %p2076_p9 }
  0x5e   : > { %p2079_p0 = pnand %p2078_p8, %p2072_p10 }
  0x60   : > { %2082 = shalt.err (!%p2079_p0)
}
  0x61   : > { %s2083_s1 = scalar_lea.vmem %s2527_s3, 8192  ;;  %s2284_s17 = smov [#allocation2]  }
  0x62   : > { %p2084_p11 = scmp.ne.s32.totalorder %s2527_s3, %s2083_s1  ;;  %s2088_s22 = sshll.u32 %s2284_s17, 4  ;;  %s2089_s22 = int_to_ptr.vmem [resolvable:$false] %s2088_s22 }
  0x63   : > { %s2090_s14 = scalar_lea.vmem %s2089_s22, 16384  ;;  %p2091_p4 = scmp.lt.s32.totalorder %s2527_s3, %s2089_s22 }
  0x64   : > { %p2086_p5 = pnand %p2084_p11, %p2070_p12  ;;  %p2092_p2 = scmp.lt.s32.totalorder %s2090_s14, %s2083_s1 }
  0x66   : > { %p2087_p1 = pneg %p2086_p5  ;;  %p2093_p3 = por %p2092_p2, %p2091_p4 }
  0x68   : > { %p2094_p9 = pnand %p2093_p3, %p2087_p1 }
  0x6a   : > { %2097 = shalt.err (!%p2094_p9)
}
  0x6b   : > { %s3220_s23 = smov 32   ;;  %s3221_s15 = smov 512  }
  0x6c   : > { %1907 = dma.hbm_to_vmem [thread:$0]  (!%p2533_p7), %s2525_s21, 8192, %s2527_s3, %s2547_s20, %s3221_s15, %s3221_s15, %s3220_s23  }
  0x6d   : > { %s205_s26 = scalar_lea.vmem [#allocation7], %s2539_s5  ;;  %s2098_s10 = scalar_lea.hbm %s2545_s18, 64 }
  0x6e   : > { %s213_s9 = sshll.u32 %s205_s26, 4  ;;  %p2099_p4 = scmp.ne.s32.totalorder %s2545_s18, %s2098_s10  ;;  %s214_s9 = int_to_ptr.vmem [resolvable:$true] %s213_s9 }
  0x6f   : > { %p3222_p1 = pneg %p2408_p6  ;;  %s2103_s1 = scalar_lea.hbm %s3171_s2, 192 }
  0x70   : > { %p2104_p13 = scmp.lt.u32.totalorder %s2545_s18, %s3171_s2  ;;  %p2105_p12 = scmp.lt.u32.totalorder %s2103_s1, %s2098_s10 }
  0x71   : > { %p2101_p0 = pnand %p2099_p4, %p3222_p1  ;;  %p2107_p7 = scmp.lt.u32.totalorder %s2098_s10, %s2545_s18 }
  0x72   : > { %p2106_p10 = por %p2105_p12, %p2104_p13 }
  0x73   : > { %p2102_p8 = pneg %p2101_p0 }
  0x74   : > { %p2108_p11 = por %p2107_p7, %p2106_p10 }
  0x76   : > { %p2109_p5 = pnand %p2108_p11, %p2102_p8 }
  0x78   : > { %2112 = shalt.err (!%p2109_p5)
}
  0x79   : > { %s2113_s3 = scalar_lea.vmem %s214_s9, 64  ;;  %p3223_p3 = pmov %p3222_p1 }
  0x7a   : > { %p2114_p2 = scmp.ne.s32.totalorder %s214_s9, %s2113_s3  ;;  %s2285_s20 = smov [#allocation7]  }
  0x7b   : > { %s2118_s21 = sshll.u32 %s2285_s20, 4  ;;  %s2119_s21 = int_to_ptr.vmem [resolvable:$false] %s2118_s21 }
  0x7c   : > { %p2116_p9 = pnand %p2114_p2, %p3223_p3  ;;  %s2120_s5 = scalar_lea.vmem %s2119_s21, 128 }
  0x7d   : > { %p2121_p1 = scmp.lt.s32.totalorder %s214_s9, %s2119_s21  ;;  %p2122_p0 = scmp.lt.s32.totalorder %s2120_s5, %s2113_s3 }
  0x7e   : > { %p2117_p4 = pneg %p2116_p9 }
  0x7f   : > { %p2123_p12 = por %p2122_p0, %p2121_p1 }
  0x81   : > { %p2124_p13 = pnand %p2123_p12, %p2117_p4 }
  0x83   : > { %2127 = shalt.err (!%p2124_p13)
}
  0x84   : > { %1913 = dma.hbm_to_vmem [thread:$0]  (!%p2408_p6), %s2545_s18, 64, %s214_s9, %s2415_s30  }
  0x85   : > { %p3224_p8 = scmp.ne.s32.totalorder %s3203_s29, 0 }
  0x86   : > { %s224_s14 = sand.u32 (!%p3224_p8), 1, %s2254_s19   ;;  %p3225_p10 = scmp.ne.s32.totalorder (!%p3224_p8), %s3208_s27, 0 }
  0x87   : > { %222 = sbr.rel (%p3224_p8) target bundleno = 572 (0x23c), region = 32  ;;  %s1496_s23 = sshll.u32 (!%p3224_p8), %s224_s14, 9 }
  0x88   : > { %s225_s15 = scalar_lea.sflag (!%p3224_p8), [#allocation3], %s224_s14  ;;  %s2602_s26 = scalar_lea.vmem (!%p3224_p8), [#allocation2], %s1496_s23 }
  0x8e   : > { %2213 = dma.done.wait (%p3225_p10), %s225_s15, 8192  }
  0x8f   : > { %2215 = vsyncadd (%p3225_p10), %s225_s15, 4294959104  ;;  %s233_s30 = sand.u32 1, %s2453_s4   ;;  %s235_s11 = sand.u32 1, %s2242_s16  }
  0x90   : > { %s1497_s29 = sshll.u32 %s235_s11, 11  ;;  %s234_s18 = scalar_lea.sflag [#allocation6], %s233_s30 }
  0x91   : > { %s2612_s9 = scalar_lea.vmem [#allocation5], %s1497_s29  ;;  %p3226_p6 = scmp.ne.s32.totalorder %s3210_s7, 0 }
  0x93   : > { %2217 = dma.done.wait (%p3226_p6), %s234_s18, 32832  }
  0x94   : > { %2219 = vsyncadd (%p3226_p6), %s234_s18, 4294934464  ;;  %v349_v0 = vld [vmem:[%s2612_s9 + $0x8] sm:$0xff]  ;;  %v351_v2 = vld [vmem:[%s2612_s9 + $0x18] sm:$0xff]  ;;  %s1498_s7 = sshll.u32 %s235_s11, 2  ;;  %s276_s4 = sand.u32 1, %s2230_s13  }
  0x95   : > { %v353_v1 = vld [vmem:[%s2612_s9 + $0x28] sm:$0xff]  ;;  %v355_v4 = vld [vmem:[%s2612_s9 + $0x38] sm:$0xff]  ;;  %v348_v5 = vld [vmem:[%s2612_s9] sm:$0xff]  ;;  %s246_s27 = scalar_lea.vmem [#allocation7], %s1498_s7  ;;  %s1499_s10 = sshll.u32 %s276_s4, 9 }
  0x96   : > { %v1511_v3 = vpack.c.bf16 %v353_v1, %v349_v0  ;;  %v352_v6 = vld [vmem:[%s2612_s9 + $0x20] sm:$0xff]  ;;  %v1639_v7 = vpack.c.bf16 %v355_v4, %v351_v2  ;;  %v350_v9 = vld [vmem:[%s2612_s9 + $0x10] sm:$0xff]  ;;  %v357_v11 = vld [vmem:[%s2612_s9 + $0x48] sm:$0xff]  ;;  %s2954_s6 = scalar_lea.vmem [#allocation8], %s1499_s10  ;;  %s3227_s24 = sld [smem:[#allocation16_spill]] }
  0x97   : > { %v1513_v8 = vpack.c.bf16 %v352_v6, %v348_v5  ;;  %v354_v10 = vld [vmem:[%s2612_s9 + $0x30] sm:$0xff]  ;;  %v361_v13 = vld [vmem:[%s2612_s9 + $0x68] sm:$0xff]  ;;  %v359_v14 = vld [vmem:[%s2612_s9 + $0x58] sm:$0xff]  ;;  %s3228_s1 = sld [smem:[#allocation15_spill]]  ;;  %s1351_s21 = sshll.u32 %s2954_s6, 4  ;;  %s3084_s21 = int_to_ptr.vmem [resolvable:$true] %s1351_s21 }
  0x98   : > { %1512 = vmatprep.subr.bf16.mxu0 %v1511_v3  ;;  %v1641_v12 = vpack.c.bf16 %v354_v10, %v350_v9  ;;  %v363_v15 = vld [vmem:[%s2612_s9 + $0x78] sm:$0xff]  ;;  %1640 = vmatprep.subr.bf16.mxu1 %v1639_v7  ;;  %v1515_v16 = vpack.c.bf16 %v361_v13, %v357_v11  ;;  %v356_v18 = vld [vmem:[%s2612_s9 + $0x40] sm:$0xff]  ;;  %v358_v20 = vld [vmem:[%s2612_s9 + $0x50] sm:$0xff]  ;;  %s3229_s23 = sld [smem:[#allocation25_spill]]  ;;  %s3093_s30 = scalar_lea.sflag [#allocation4], %s276_s4 }
  0x99   : > { %1514 = vmatpush1.bf16.msra.mxu0 %v1513_v8  ;;  %v1643_v17 = vpack.c.bf16 %v363_v15, %v359_v14  ;;  %v360_v19 = vld [vmem:[%s2612_s9 + $0x60] sm:$0xff]  ;;  %v362_v22 = vld [vmem:[%s2612_s9 + $0x70] sm:$0xff]  ;;  %v365_v23 = vld [vmem:[%s2612_s9 + $0x88] sm:$0xff]  ;;  %s2128_s11 = scalar_lea.vmem %s3084_s21, 8192  ;;  %p3231_p11 = scmp.ne.s32.totalorder %s3215_s28, 0 }
  0x9a   : > { %1642 = vmatpush1.bf16.msra.mxu1 %v1641_v12  ;;  %v1517_v21 = vpack.c.bf16 %v360_v19, %v356_v18  ;;  %v369_v24 = vld [vmem:[%s2612_s9 + $0xa8] sm:$0xff]  ;;  %1516 = vmatprep.subr.bf16.mxu0 %v1515_v16  ;;  %v1645_v25 = vpack.c.bf16 %v362_v22, %v358_v20  ;;  %v367_v27 = vld [vmem:[%s2612_s9 + $0x98] sm:$0xff]  ;;  %v364_v29 = vld [vmem:[%s2612_s9 + $0x80] sm:$0xff]  ;;  %p2129_p7 = scmp.ne.s32.totalorder %s3084_s21, %s2128_s11  ;;  %s2286_s29 = smov [#allocation8]  }
  0x9b   : > { %1644 = vmatprep.subr.bf16.mxu1 %v1643_v17  ;;  %v1519_v26 = vpack.c.bf16 %v369_v24, %v365_v23  ;;  %v371_v28 = vld [vmem:[%s2612_s9 + $0xb8] sm:$0xff]  ;;  %v368_v31 = vld [vmem:[%s2612_s9 + $0xa0] sm:$0xff]  ;;  %v366_v32 = vld [vmem:[%s2612_s9 + $0x90] sm:$0xff]  ;;  %s2132_s18 = sshll.u32 %s2286_s29, 4  ;;  %s2133_s18 = int_to_ptr.vmem [resolvable:$false] %s2132_s18 }
  0x9c   : > { %v1647_v30 = vpack.c.bf16 %v371_v28, %v367_v27  ;;  %v370_v33 = vld [vmem:[%s2612_s9 + $0xb0] sm:$0xff]  ;;  %v1521_v34 = vpack.c.bf16 %v368_v31, %v364_v29  ;;  %v373_v35 = vld [vmem:[%s2612_s9 + $0xc8] sm:$0xff]  ;;  %v375_v37 = vld [vmem:[%s2612_s9 + $0xd8] sm:$0xff]  ;;  %s1895_s17 = smul.u32 192, %s3227_s24  ;;  %p2130_p5 = pnand %p2129_p7, %p3231_p11 }
  0x9d   : > { %1518 = vmatpush1.bf16.msra.mxu0 %v1517_v21  ;;  %v377_v36 = vld [vmem:[%s2612_s9 + $0xe8] sm:$0xff]  ;;  %v1649_v38 = vpack.c.bf16 %v370_v33, %v366_v32  ;;  %v379_v40 = vld [vmem:[%s2612_s9 + $0xf8] sm:$0xff]  ;;  %v372_v41 = vld [vmem:[%s2612_s9 + $0xc0] sm:$0xff]  ;;  %s1502_s22 = sshll.u32 %s3228_s1, 2  ;;  %p2135_p3 = scmp.lt.s32.totalorder %s3084_s21, %s2133_s18 }
  0x9e   : > { %1646 = vmatpush1.bf16.msra.mxu1 %v1645_v25  ;;  %1520 = vmatprep.subr.bf16.mxu0 %v1519_v26  ;;  %v1523_v39 = vpack.c.bf16 %v377_v36, %v373_v35  ;;  %v376_v42 = vld [vmem:[%s2612_s9 + $0xe0] sm:$0xff]  ;;  %v1651_v43 = vpack.c.bf16 %v379_v40, %v375_v37  ;;  %v374_v44 = vld [vmem:[%s2612_s9 + $0xd0] sm:$0xff]  ;;  %v381_v46 = vld [vmem:[%s2612_s9 + $0x108] sm:$0xff]  ;;  %s1348_s3 = sadd.s32 %s1895_s17, %s1502_s22  ;;  %p2131_p2 = pneg %p2130_p5 }
  0x9f   : > { %1648 = vmatprep.subr.bf16.mxu1 %v1647_v30  ;;  %v378_v45 = vld [vmem:[%s2612_s9 + $0xf0] sm:$0xff]  ;;  %v385_v47 = vld [vmem:[%s2612_s9 + $0x128] sm:$0xff]  ;;  %v383_v48 = vld [vmem:[%s2612_s9 + $0x118] sm:$0xff]  ;;  %v1525_v50 = vpack.c.bf16 %v376_v42, %v372_v41  ;;  %s1504_s20 = sshll.u32 %s1348_s3, 7 }
  0xa0   : > { %v387_v49 = vld [vmem:[%s2612_s9 + $0x138] sm:$0xff]  ;;  %v1653_v51 = vpack.c.bf16 %v378_v45, %v374_v44  ;;  %v1527_v52 = vpack.c.bf16 %v385_v47, %v381_v46  ;;  %v380_v53 = vld [vmem:[%s2612_s9 + $0x100] sm:$0xff]  ;;  %v382_v55 = vld [vmem:[%s2612_s9 + $0x110] sm:$0xff]  ;;  %s3080_s15 = scalar_lea.hbm %s3229_s23, %s1504_s20 }
  0xa1   : > { %1522 = vmatpush1.bf16.msra.mxu0 %v1521_v34  ;;  %v384_v54 = vld [vmem:[%s2612_s9 + $0x120] sm:$0xff]  ;;  %v1655_v56 = vpack.c.bf16 %v387_v49, %v383_v48  ;;  %v386_v57 = vld [vmem:[%s2612_s9 + $0x130] sm:$0xff]  ;;  %v389_v58 = vld [vmem:[%s2612_s9 + $0x148] sm:$0xff] }
  0xa2   : > { %1650 = vmatpush1.bf16.msra.mxu1 %v1649_v38  ;;  %1524 = vmatprep.subr.bf16.mxu0 %v1523_v39  ;;  %v393_v59 = vld [vmem:[%s2612_s9 + $0x168] sm:$0xff]  ;;  %v391_v60 = vld [vmem:[%s2612_s9 + $0x158] sm:$0xff]  ;;  %v1529_v62 = vpack.c.bf16 %v384_v54, %v380_v53  ;;  %v1657_v63 = vpack.c.bf16 %v386_v57, %v382_v55  ;;  %v388_v1 = vld [vmem:[%s2612_s9 + $0x140] sm:$0xff] }
  0xa3   : > { %1652 = vmatprep.subr.bf16.mxu1 %v1651_v43  ;;  %v395_v61 = vld [vmem:[%s2612_s9 + $0x178] sm:$0xff]  ;;  %v1531_v0 = vpack.c.bf16 %v393_v59, %v389_v58  ;;  %v392_v2 = vld [vmem:[%s2612_s9 + $0x160] sm:$0xff]  ;;  %v390_v3 = vld [vmem:[%s2612_s9 + $0x150] sm:$0xff] }
  0xa4   : > { %v1659_v4 = vpack.c.bf16 %v395_v61, %v391_v60  ;;  %v394_v5 = vld [vmem:[%s2612_s9 + $0x170] sm:$0xff]  ;;  %v397_v6 = vld [vmem:[%s2612_s9 + $0x188] sm:$0xff]  ;;  %v399_v8 = vld [vmem:[%s2612_s9 + $0x198] sm:$0xff]  ;;  %v1533_v10 = vpack.c.bf16 %v392_v2, %v388_v1 }
  0xa5   : > { %1526 = vmatpush1.bf16.msra.mxu0 %v1525_v50  ;;  %v401_v7 = vld [vmem:[%s2612_s9 + $0x1a8] sm:$0xff]  ;;  %v403_v9 = vld [vmem:[%s2612_s9 + $0x1b8] sm:$0xff]  ;;  %v1661_v11 = vpack.c.bf16 %v394_v5, %v390_v3  ;;  %v396_v13 = vld [vmem:[%s2612_s9 + $0x180] sm:$0xff] }
  0xa6   : > { %1654 = vmatpush1.bf16.msra.mxu1 %v1653_v51  ;;  %1528 = vmatprep.subr.bf16.mxu0 %v1527_v52  ;;  %v1535_v12 = vpack.c.bf16 %v401_v7, %v397_v6  ;;  %v400_v14 = vld [vmem:[%s2612_s9 + $0x1a0] sm:$0xff]  ;;  %v398_v15 = vld [vmem:[%s2612_s9 + $0x190] sm:$0xff]  ;;  %v1663_v16 = vpack.c.bf16 %v403_v9, %v399_v8  ;;  %v405_v18 = vld [vmem:[%s2612_s9 + $0x1c8] sm:$0xff] }
  0xa7   : > { %1656 = vmatprep.subr.bf16.mxu1 %v1655_v56  ;;  %v402_v17 = vld [vmem:[%s2612_s9 + $0x1b0] sm:$0xff]  ;;  %v409_v19 = vld [vmem:[%s2612_s9 + $0x1e8] sm:$0xff]  ;;  %v407_v20 = vld [vmem:[%s2612_s9 + $0x1d8] sm:$0xff]  ;;  %v1537_v22 = vpack.c.bf16 %v400_v14, %v396_v13 }
  0xa8   : > { %v411_v21 = vld [vmem:[%s2612_s9 + $0x1f8] sm:$0xff]  ;;  %v1665_v23 = vpack.c.bf16 %v402_v17, %v398_v15  ;;  %v1539_v24 = vpack.c.bf16 %v409_v19, %v405_v18  ;;  %v404_v25 = vld [vmem:[%s2612_s9 + $0x1c0] sm:$0xff]  ;;  %v406_v27 = vld [vmem:[%s2612_s9 + $0x1d0] sm:$0xff] }
  0xa9   : > { %1530 = vmatpush1.bf16.msra.mxu0 %v1529_v62  ;;  %v408_v26 = vld [vmem:[%s2612_s9 + $0x1e0] sm:$0xff]  ;;  %v1667_v28 = vpack.c.bf16 %v411_v21, %v407_v20  ;;  %v410_v29 = vld [vmem:[%s2612_s9 + $0x1f0] sm:$0xff]  ;;  %v413_v30 = vld [vmem:[%s2612_s9 + $0x208] sm:$0xff] }
  0xaa   : > { %1658 = vmatpush1.bf16.msra.mxu1 %v1657_v63  ;;  %1532 = vmatprep.subr.bf16.mxu0 %v1531_v0  ;;  %v417_v31 = vld [vmem:[%s2612_s9 + $0x228] sm:$0xff]  ;;  %v415_v32 = vld [vmem:[%s2612_s9 + $0x218] sm:$0xff]  ;;  %v1541_v34 = vpack.c.bf16 %v408_v26, %v404_v25  ;;  %v1669_v35 = vpack.c.bf16 %v410_v29, %v406_v27  ;;  %v412_v37 = vld [vmem:[%s2612_s9 + $0x200] sm:$0xff] }
  0xab   : > { %1660 = vmatprep.subr.bf16.mxu1 %v1659_v4  ;;  %v419_v33 = vld [vmem:[%s2612_s9 + $0x238] sm:$0xff]  ;;  %v1543_v36 = vpack.c.bf16 %v417_v31, %v413_v30  ;;  %v416_v38 = vld [vmem:[%s2612_s9 + $0x220] sm:$0xff]  ;;  %v414_v39 = vld [vmem:[%s2612_s9 + $0x210] sm:$0xff] }
  0xac   : > { %v1671_v40 = vpack.c.bf16 %v419_v33, %v415_v32  ;;  %v418_v41 = vld [vmem:[%s2612_s9 + $0x230] sm:$0xff]  ;;  %v421_v42 = vld [vmem:[%s2612_s9 + $0x248] sm:$0xff]  ;;  %v423_v44 = vld [vmem:[%s2612_s9 + $0x258] sm:$0xff]  ;;  %v1545_v46 = vpack.c.bf16 %v416_v38, %v412_v37 }
  0xad   : > { %1534 = vmatpush1.bf16.msra.mxu0 %v1533_v10  ;;  %v425_v43 = vld [vmem:[%s2612_s9 + $0x268] sm:$0xff]  ;;  %v427_v45 = vld [vmem:[%s2612_s9 + $0x278] sm:$0xff]  ;;  %v1673_v47 = vpack.c.bf16 %v418_v41, %v414_v39  ;;  %v420_v49 = vld [vmem:[%s2612_s9 + $0x240] sm:$0xff] }
  0xae   : > { %1662 = vmatpush1.bf16.msra.mxu1 %v1661_v11  ;;  %1536 = vmatprep.subr.bf16.mxu0 %v1535_v12  ;;  %v1547_v48 = vpack.c.bf16 %v425_v43, %v421_v42  ;;  %v424_v50 = vld [vmem:[%s2612_s9 + $0x260] sm:$0xff]  ;;  %v422_v51 = vld [vmem:[%s2612_s9 + $0x250] sm:$0xff]  ;;  %v1675_v52 = vpack.c.bf16 %v427_v45, %v423_v44  ;;  %v429_v54 = vld [vmem:[%s2612_s9 + $0x288] sm:$0xff] }
  0xaf   : > { %1664 = vmatprep.subr.bf16.mxu1 %v1663_v16  ;;  %v426_v53 = vld [vmem:[%s2612_s9 + $0x270] sm:$0xff]  ;;  %v433_v55 = vld [vmem:[%s2612_s9 + $0x2a8] sm:$0xff]  ;;  %v431_v56 = vld [vmem:[%s2612_s9 + $0x298] sm:$0xff]  ;;  %v1549_v58 = vpack.c.bf16 %v424_v50, %v420_v49 }
  0xb0   : > { %v435_v57 = vld [vmem:[%s2612_s9 + $0x2b8] sm:$0xff]  ;;  %v1677_v59 = vpack.c.bf16 %v426_v53, %v422_v51  ;;  %v1551_v60 = vpack.c.bf16 %v433_v55, %v429_v54  ;;  %v428_v61 = vld [vmem:[%s2612_s9 + $0x280] sm:$0xff]  ;;  %v430_v63 = vld [vmem:[%s2612_s9 + $0x290] sm:$0xff] }
  0xb1   : > { %1538 = vmatpush1.bf16.msra.mxu0 %v1537_v22  ;;  %v432_v62 = vld [vmem:[%s2612_s9 + $0x2a0] sm:$0xff]  ;;  %v1679_v0 = vpack.c.bf16 %v435_v57, %v431_v56  ;;  %v434_v1 = vld [vmem:[%s2612_s9 + $0x2b0] sm:$0xff]  ;;  %v437_v2 = vld [vmem:[%s2612_s9 + $0x2c8] sm:$0xff] }
  0xb2   : > { %1666 = vmatpush1.bf16.msra.mxu1 %v1665_v23  ;;  %1540 = vmatprep.subr.bf16.mxu0 %v1539_v24  ;;  %v441_v3 = vld [vmem:[%s2612_s9 + $0x2e8] sm:$0xff]  ;;  %v439_v4 = vld [vmem:[%s2612_s9 + $0x2d8] sm:$0xff]  ;;  %v1553_v6 = vpack.c.bf16 %v432_v62, %v428_v61  ;;  %v436_v7 = vld [vmem:[%s2612_s9 + $0x2c0] sm:$0xff]  ;;  %v1681_v8 = vpack.c.bf16 %v434_v1, %v430_v63 }
  0xb3   : > { %1668 = vmatprep.subr.bf16.mxu1 %v1667_v28  ;;  %v443_v5 = vld [vmem:[%s2612_s9 + $0x2f8] sm:$0xff]  ;;  %v1555_v9 = vpack.c.bf16 %v441_v3, %v437_v2  ;;  %v440_v10 = vld [vmem:[%s2612_s9 + $0x2e0] sm:$0xff]  ;;  %v438_v11 = vld [vmem:[%s2612_s9 + $0x2d0] sm:$0xff] }
  0xb4   : > { %v442_v12 = vld [vmem:[%s2612_s9 + $0x2f0] sm:$0xff]  ;;  %v1683_v13 = vpack.c.bf16 %v443_v5, %v439_v4  ;;  %v445_v14 = vld [vmem:[%s2612_s9 + $0x308] sm:$0xff]  ;;  %v447_v17 = vld [vmem:[%s2612_s9 + $0x318] sm:$0xff]  ;;  %v1557_v19 = vpack.c.bf16 %v440_v10, %v436_v7 }
  0xb5   : > { %1542 = vmatpush1.bf16.msra.mxu0 %v1541_v34  ;;  %v449_v15 = vld [vmem:[%s2612_s9 + $0x328] sm:$0xff]  ;;  %v451_v18 = vld [vmem:[%s2612_s9 + $0x338] sm:$0xff]  ;;  %v1685_v20 = vpack.c.bf16 %v442_v12, %v438_v11  ;;  %v444_v22 = vld [vmem:[%s2612_s9 + $0x300] sm:$0xff] }
  0xb6   : > { %1670 = vmatpush1.bf16.msra.mxu1 %v1669_v35  ;;  %1544 = vmatprep.subr.bf16.mxu0 %v1543_v36  ;;  %v285_v16 = vld [vmem:[%s2602_s26 + $0x8] sm:$0xff]  ;;  %v1559_v21 = vpack.c.bf16 %v449_v15, %v445_v14  ;;  %v448_v23 = vld [vmem:[%s2612_s9 + $0x320] sm:$0xff]  ;;  %v446_v24 = vld [vmem:[%s2612_s9 + $0x310] sm:$0xff]  ;;  %v1687_v25 = vpack.c.bf16 %v451_v18, %v447_v17 }
  0xb7   : > { %1672 = vmatprep.subr.bf16.mxu1 %v1671_v40  ;;  %690 = vmatprep.mubr.f32.mxu0 %v285_v16  ;;  %v450_v26 = vld [vmem:[%s2612_s9 + $0x330] sm:$0xff]  ;;  %v453_v27 = vld [vmem:[%s2612_s9 + $0x348] sm:$0xff]  ;;  %v455_v29 = vld [vmem:[%s2612_s9 + $0x358] sm:$0xff]  ;;  %v1561_v31 = vpack.c.bf16 %v448_v23, %v444_v22 }
  0xb8   : > { %1012 = vmatprep.mubr.f32.mxu1 %v285_v16  ;;  %v457_v28 = vld [vmem:[%s2612_s9 + $0x368] sm:$0xff]  ;;  %v459_v30 = vld [vmem:[%s2612_s9 + $0x378] sm:$0xff]  ;;  %v1689_v32 = vpack.c.bf16 %v450_v26, %v446_v24  ;;  %v452_v34 = vld [vmem:[%s2612_s9 + $0x340] sm:$0xff] }
  0xb9   : > { %1546 = vmatpush1.bf16.msra.mxu0 %v1545_v46  ;;  %v1563_v33 = vpack.c.bf16 %v457_v28, %v453_v27  ;;  %v456_v35 = vld [vmem:[%s2612_s9 + $0x360] sm:$0xff]  ;;  %v454_v36 = vld [vmem:[%s2612_s9 + $0x350] sm:$0xff]  ;;  %v1691_v37 = vpack.c.bf16 %v459_v30, %v455_v29  ;;  %v461_v39 = vld [vmem:[%s2612_s9 + $0x388] sm:$0xff] }
  0xba   : > { %1674 = vmatpush1.bf16.msra.mxu1 %v1673_v47  ;;  %1548 = vmatprep.subr.bf16.mxu0 %v1547_v48  ;;  %v458_v38 = vld [vmem:[%s2612_s9 + $0x370] sm:$0xff]  ;;  %v465_v40 = vld [vmem:[%s2612_s9 + $0x3a8] sm:$0xff]  ;;  %v463_v41 = vld [vmem:[%s2612_s9 + $0x398] sm:$0xff]  ;;  %v1565_v43 = vpack.c.bf16 %v456_v35, %v452_v34 }
  0xbb   : > { %1676 = vmatprep.subr.bf16.mxu1 %v1675_v52  ;;  %v467_v42 = vld [vmem:[%s2612_s9 + $0x3b8] sm:$0xff]  ;;  %v1693_v44 = vpack.c.bf16 %v458_v38, %v454_v36  ;;  %v1567_v45 = vpack.c.bf16 %v465_v40, %v461_v39  ;;  %v460_v46 = vld [vmem:[%s2612_s9 + $0x380] sm:$0xff]  ;;  %v462_v48 = vld [vmem:[%s2612_s9 + $0x390] sm:$0xff] }
  0xbc   : > { %v464_v47 = vld [vmem:[%s2612_s9 + $0x3a0] sm:$0xff]  ;;  %v1695_v49 = vpack.c.bf16 %v467_v42, %v463_v41  ;;  %v466_v50 = vld [vmem:[%s2612_s9 + $0x3b0] sm:$0xff]  ;;  %v469_v51 = vld [vmem:[%s2612_s9 + $0x3c8] sm:$0xff] }
  0xbd   : > { %1550 = vmatpush1.bf16.msra.mxu0 %v1549_v58  ;;  %v473_v52 = vld [vmem:[%s2612_s9 + $0x3e8] sm:$0xff]  ;;  %v471_v53 = vld [vmem:[%s2612_s9 + $0x3d8] sm:$0xff]  ;;  %v1569_v55 = vpack.c.bf16 %v464_v47, %v460_v46  ;;  %v1697_v56 = vpack.c.bf16 %v466_v50, %v462_v48  ;;  %v468_v58 = vld [vmem:[%s2612_s9 + $0x3c0] sm:$0xff] }
  0xbe   : > { %1678 = vmatpush1.bf16.msra.mxu1 %v1677_v59  ;;  %1552 = vmatprep.subr.bf16.mxu0 %v1551_v60  ;;  %v475_v54 = vld [vmem:[%s2612_s9 + $0x3f8] sm:$0xff]  ;;  %v1571_v57 = vpack.c.bf16 %v473_v52, %v469_v51  ;;  %v472_v59 = vld [vmem:[%s2612_s9 + $0x3e0] sm:$0xff]  ;;  %v470_v60 = vld [vmem:[%s2612_s9 + $0x3d0] sm:$0xff] }
  0xbf   : > { %1680 = vmatprep.subr.bf16.mxu1 %v1679_v0  ;;  %v1699_v61 = vpack.c.bf16 %v475_v54, %v471_v53  ;;  %v474_v62 = vld [vmem:[%s2612_s9 + $0x3f0] sm:$0xff]  ;;  %v477_v63 = vld [vmem:[%s2612_s9 + $0x408] sm:$0xff]  ;;  %v479_v1 = vld [vmem:[%s2612_s9 + $0x418] sm:$0xff]  ;;  %v1573_v3 = vpack.c.bf16 %v472_v59, %v468_v58 }
  0xc0   : > { %v481_v0 = vld [vmem:[%s2612_s9 + $0x428] sm:$0xff]  ;;  %v483_v2 = vld [vmem:[%s2612_s9 + $0x438] sm:$0xff]  ;;  %v1701_v4 = vpack.c.bf16 %v474_v62, %v470_v60  ;;  %v480_v7 = vld [vmem:[%s2612_s9 + $0x420] sm:$0xff] }
  0xc1   : > { %1554 = vmatpush1.bf16.msra.mxu0 %v1553_v6  ;;  %v1575_v5 = vpack.c.bf16 %v481_v0, %v477_v63  ;;  %v476_v6 = vld [vmem:[%s2612_s9 + $0x400] sm:$0xff]  ;;  %v482_v10 = vld [vmem:[%s2612_s9 + $0x430] sm:$0xff]  ;;  %v485_v11 = vld [vmem:[%s2612_s9 + $0x448] sm:$0xff] }
  0xc2   : > { %1682 = vmatpush1.bf16.msra.mxu1 %v1681_v8  ;;  %1556 = vmatprep.subr.bf16.mxu0 %v1555_v9  ;;  %v1703_v8 = vpack.c.bf16 %v483_v2, %v479_v1  ;;  %v478_v9 = vld [vmem:[%s2612_s9 + $0x410] sm:$0xff]  ;;  %v489_v12 = vld [vmem:[%s2612_s9 + $0x468] sm:$0xff]  ;;  %v1577_v14 = vpack.c.bf16 %v480_v7, %v476_v6  ;;  %v487_v15 = vld [vmem:[%s2612_s9 + $0x458] sm:$0xff] }
  0xc3   : > { %1684 = vmatprep.subr.bf16.mxu1 %v1683_v13  ;;  %v284_v13 = vld [vmem:[%s2602_s26] sm:$0xff]  ;;  %v491_v16 = vld [vmem:[%s2612_s9 + $0x478] sm:$0xff]  ;;  %v1705_v17 = vpack.c.bf16 %v482_v10, %v478_v9  ;;  %v486_v22 = vld [vmem:[%s2612_s9 + $0x450] sm:$0xff] }
  0xc4   : > { %v484_v18 = vld [vmem:[%s2612_s9 + $0x440] sm:$0xff]  ;;  %v490_v23 = vld [vmem:[%s2612_s9 + $0x470] sm:$0xff]  ;;  %v1707_v24 = vpack.c.bf16 %v491_v16, %v487_v15  ;;  %v497_v26 = vld [vmem:[%s2612_s9 + $0x4a8] sm:$0xff] }
  0xc5   : > { %1558 = vmatpush1.bf16.msra.mxu0 %v1557_v19  ;;  %v488_v19 = vld [vmem:[%s2612_s9 + $0x460] sm:$0xff]  ;;  %v495_v29 = vld [vmem:[%s2612_s9 + $0x498] sm:$0xff]  ;;  %v293_v34 = vld [vmem:[%s2602_s26 + $0x48] sm:$0xff] }
  0xc6   : > { %1686 = vmatpush1.bf16.msra.mxu1 %v1685_v20  ;;  %1560 = vmatprep.subr.bf16.mxu0 %v1559_v21  ;;  %v289_v20 = vld [vmem:[%s2602_s26 + $0x28] sm:$0xff]  ;;  %v1579_v21 = vpack.c.bf16 %v489_v12, %v485_v11  ;;  %v288_v27 = vld [vmem:[%s2602_s26 + $0x20] sm:$0xff]  ;;  %v1581_v28 = vpack.c.bf16 %v488_v19, %v484_v18  ;;  %v499_v30 = vld [vmem:[%s2612_s9 + $0x4b8] sm:$0xff] }
  0xc7   : > { %1688 = vmatprep.subr.bf16.mxu1 %v1687_v25  ;;  %v493_v25 = vld [vmem:[%s2612_s9 + $0x488] sm:$0xff]  ;;  %v494_v36 = vld [vmem:[%s2612_s9 + $0x490] sm:$0xff]  ;;  %v1711_v38 = vpack.c.bf16 %v499_v30, %v495_v29  ;;  %v292_v41 = vld [vmem:[%s2602_s26 + $0x40] sm:$0xff] }
  0xc8   : > { %v1583_v35 = vpack.c.bf16 %v497_v26, %v493_v25  ;;  %v501_v39 = vld [vmem:[%s2612_s9 + $0x4c8] sm:$0xff]  ;;  %v500_v46 = vld [vmem:[%s2612_s9 + $0x4c0] sm:$0xff]  ;;  %v502_v50 = vld [vmem:[%s2612_s9 + $0x4d0] sm:$0xff] }
  0xc9   : > { %1562 = vmatpush1.bf16.msra.mxu0 %v1561_v31  ;;  %v1709_v31 = vpack.c.bf16 %v490_v23, %v486_v22  ;;  %v505_v40 = vld [vmem:[%s2612_s9 + $0x4e8] sm:$0xff]  ;;  %v504_v47 = vld [vmem:[%s2612_s9 + $0x4e0] sm:$0xff]  ;;  %v506_v51 = vld [vmem:[%s2612_s9 + $0x4f0] sm:$0xff] }
  0xca   : > { %1690 = vmatpush1.bf16.msra.mxu1 %v1689_v32  ;;  %1564 = vmatprep.subr.bf16.mxu0 %v1563_v33  ;;  %v492_v32 = vld [vmem:[%s2612_s9 + $0x480] sm:$0xff]  ;;  %v297_v48 = vld [vmem:[%s2602_s26 + $0x68] sm:$0xff]  ;;  %v515_v58 = vld [vmem:[%s2612_s9 + $0x538] sm:$0xff]  ;;  %v1717_v59 = vpack.c.bf16 %v506_v51, %v502_v50 }
  0xcb   : > { %1692 = vmatprep.subr.bf16.mxu1 %v1691_v37  ;;  %v496_v33 = vld [vmem:[%s2612_s9 + $0x4a0] sm:$0xff]  ;;  %v498_v37 = vld [vmem:[%s2612_s9 + $0x4b0] sm:$0xff]  ;;  %v509_v53 = vld [vmem:[%s2612_s9 + $0x508] sm:$0xff] }
  0xcc   : > { %v1585_v42 = vpack.c.bf16 %v496_v33, %v492_v32  ;;  %v513_v54 = vld [vmem:[%s2612_s9 + $0x528] sm:$0xff]  ;;  %v508_v60 = vld [vmem:[%s2612_s9 + $0x500] sm:$0xff]  ;;  %v510_v0 = vld [vmem:[%s2612_s9 + $0x510] sm:$0xff] }
  0xcd   : > { %1566 = vmatpush1.bf16.msra.mxu0 %v1565_v43  ;;  %v503_v43 = vld [vmem:[%s2612_s9 + $0x4d8] sm:$0xff]  ;;  %v301_v62 = vld [vmem:[%s2602_s26 + $0x88] sm:$0xff]  ;;  %v1591_v63 = vpack.c.bf16 %v513_v54, %v509_v53  ;;  %v514_v1 = vld [vmem:[%s2612_s9 + $0x530] sm:$0xff] }
  0xce   : > { %1694 = vmatpush1.bf16.msra.mxu1 %v1693_v44  ;;  %1568 = vmatprep.subr.bf16.mxu0 %v1567_v45  ;;  %v507_v44 = vld [vmem:[%s2612_s9 + $0x4f8] sm:$0xff]  ;;  %v1713_v45 = vpack.c.bf16 %v498_v37, %v494_v36  ;;  %v1721_v9 = vpack.c.bf16 %v514_v1, %v510_v0  ;;  %v516_v10 = vld [vmem:[%s2612_s9 + $0x540] sm:$0xff]  ;;  %v305_v12 = vld [vmem:[%s2602_s26 + $0xa8] sm:$0xff] }
  0xcf   : > { %1696 = vmatprep.subr.bf16.mxu1 %v1695_v49  ;;  %v1587_v49 = vpack.c.bf16 %v505_v40, %v501_v39  ;;  %v1715_v52 = vpack.c.bf16 %v507_v44, %v503_v43  ;;  %v519_v7 = vld [vmem:[%s2612_s9 + $0x558] sm:$0xff]  ;;  %v520_v11 = vld [vmem:[%s2612_s9 + $0x560] sm:$0xff]  ;;  %v522_v15 = vld [vmem:[%s2612_s9 + $0x570] sm:$0xff] }
  0xd0   : > { %v529_v18 = vld [vmem:[%s2612_s9 + $0x5a8] sm:$0xff]  ;;  %v304_v19 = vld [vmem:[%s2602_s26 + $0xa0] sm:$0xff]  ;;  %v531_v22 = vld [vmem:[%s2612_s9 + $0x5b8] sm:$0xff] }
  0xd1   : > { %1570 = vmatpush1.bf16.msra.mxu0 %v1569_v55  ;;  %v296_v55 = vld [vmem:[%s2602_s26 + $0x60] sm:$0xff]  ;;  %v309_v26 = vld [vmem:[%s2602_s26 + $0xc8] sm:$0xff]  ;;  %v530_v29 = vld [vmem:[%s2612_s9 + $0x5b0] sm:$0xff] }
  0xd2   : > { %1698 = vmatpush1.bf16.msra.mxu1 %v1697_v56  ;;  %1572 = vmatprep.subr.bf16.mxu0 %v1571_v57  ;;  %v1589_v56 = vpack.c.bf16 %v504_v47, %v500_v46  ;;  %v511_v57 = vld [vmem:[%s2612_s9 + $0x518] sm:$0xff]  ;;  %v528_v25 = vld [vmem:[%s2612_s9 + $0x5a0] sm:$0xff]  ;;  %v537_v32 = vld [vmem:[%s2612_s9 + $0x5e8] sm:$0xff] }
  0xd3   : > { %1700 = vmatprep.subr.bf16.mxu1 %v1699_v61  ;;  %v512_v61 = vld [vmem:[%s2612_s9 + $0x520] sm:$0xff]  ;;  %v1719_v2 = vpack.c.bf16 %v515_v58, %v511_v57  ;;  %v539_v36 = vld [vmem:[%s2612_s9 + $0x5f8] sm:$0xff]  ;;  %v313_v40 = vld [vmem:[%s2602_s26 + $0xe8] sm:$0xff] }
  0xd4   : > { %v1593_v6 = vpack.c.bf16 %v512_v61, %v508_v60  ;;  %v308_v33 = vld [vmem:[%s2602_s26 + $0xc0] sm:$0xff]  ;;  %v538_v43 = vld [vmem:[%s2612_s9 + $0x5f0] sm:$0xff]  ;;  %v545_v46 = vld [vmem:[%s2612_s9 + $0x628] sm:$0xff] }
  0xd5   : > { %1574 = vmatpush1.bf16.msra.mxu0 %v1573_v3  ;;  %v517_v3 = vld [vmem:[%s2612_s9 + $0x548] sm:$0xff]  ;;  %v536_v39 = vld [vmem:[%s2612_s9 + $0x5e0] sm:$0xff]  ;;  %v547_v50 = vld [vmem:[%s2612_s9 + $0x638] sm:$0xff] }
  0xd6   : > { %1702 = vmatpush1.bf16.msra.mxu1 %v1701_v4  ;;  %1576 = vmatprep.subr.bf16.mxu0 %v1575_v5  ;;  %v521_v4 = vld [vmem:[%s2612_s9 + $0x568] sm:$0xff]  ;;  %v300_v5 = vld [vmem:[%s2602_s26 + $0x80] sm:$0xff]  ;;  %v546_v57 = vld [vmem:[%s2612_s9 + $0x630] sm:$0xff] }
  0xd7   : > { %1704 = vmatprep.subr.bf16.mxu1 %v1703_v8  ;;  %v523_v8 = vld [vmem:[%s2612_s9 + $0x578] sm:$0xff]  ;;  %v312_v47 = vld [vmem:[%s2602_s26 + $0xe0] sm:$0xff]  ;;  %v317_v54 = vld [vmem:[%s2602_s26 + $0x108] sm:$0xff] }
  0xd8   : > { %691 = vmatmul.mubr.f32.vlgmr.msra.gmra.mrb[0].mxu0 %v284_v13  ;;  %v1723_v16 = vpack.c.bf16 %v523_v8, %v519_v7  ;;  %v544_v53 = vld [vmem:[%s2612_s9 + $0x620] sm:$0xff]  ;;  %v553_v60 = vld [vmem:[%s2612_s9 + $0x668] sm:$0xff]  ;;  %v555_v0 = vld [vmem:[%s2612_s9 + $0x678] sm:$0xff] }
  0xd9   : > { %1013 = vmatmul.mubr.f32.vlgmr.msra.gmra.mrb[0].mxu1 %v284_v13  ;;  %1578 = vmatpush1.bf16.msra.mxu0 %v1577_v14  ;;  %v1595_v13 = vpack.c.bf16 %v521_v4, %v517_v3  ;;  %v518_v14 = vld [vmem:[%s2612_s9 + $0x550] sm:$0xff]  ;;  %v316_v61 = vld [vmem:[%s2602_s26 + $0x100] sm:$0xff]  ;;  %v321_v4 = vld [vmem:[%s2602_s26 + $0x128] sm:$0xff] }
  0xda   : > { %1706 = vmatpush1.bf16.msra.mxu1 %v1705_v17  ;;  %696 = vmatprep.mubr.f32.mxu0 %v289_v20  ;;  %v525_v17 = vld [vmem:[%s2612_s9 + $0x588] sm:$0xff]  ;;  %v1725_v23 = vpack.c.bf16 %v522_v15, %v518_v14  ;;  %v552_v3 = vld [vmem:[%s2612_s9 + $0x660] sm:$0xff]  ;;  %v554_v7 = vld [vmem:[%s2612_s9 + $0x670] sm:$0xff] }
  0xdb   : > { %1018 = vmatprep.mubr.f32.mxu1 %v289_v20  ;;  %1580 = vmatprep.subr.bf16.mxu0 %v1579_v21  ;;  %v1597_v20 = vpack.c.bf16 %v520_v11, %v516_v10  ;;  %v527_v21 = vld [vmem:[%s2612_s9 + $0x598] sm:$0xff]  ;;  %v561_v10 = vld [vmem:[%s2612_s9 + $0x6a8] sm:$0xff]  ;;  %v320_v11 = vld [vmem:[%s2602_s26 + $0x120] sm:$0xff] }
  0xdc   : > { %697 = vmatmul.mubr.f32.gmra.mrb[2].mxu0 %v288_v27  ;;  %1708 = vmatprep.subr.bf16.mxu1 %v1707_v24  ;;  %v524_v24 = vld [vmem:[%s2612_s9 + $0x580] sm:$0xff]  ;;  %v1727_v30 = vpack.c.bf16 %v531_v22, %v527_v21  ;;  %v563_v14 = vld [vmem:[%s2612_s9 + $0x6b8] sm:$0xff]  ;;  %v562_v21 = vld [vmem:[%s2612_s9 + $0x6b0] sm:$0xff] }
  0xdd   : > { %1019 = vmatmul.mubr.f32.gmra.mrb[2].mxu1 %v288_v27  ;;  %1582 = vmatpush1.bf16.msra.mxu0 %v1581_v28  ;;  %v1599_v27 = vpack.c.bf16 %v529_v18, %v525_v17  ;;  %v526_v28 = vld [vmem:[%s2612_s9 + $0x590] sm:$0xff]  ;;  %v560_v17 = vld [vmem:[%s2612_s9 + $0x6a0] sm:$0xff]  ;;  %v325_v18 = vld [vmem:[%s2602_s26 + $0x148] sm:$0xff] }
  0xde   : > { %1710 = vmatpush1.bf16.msra.mxu1 %v1709_v31  ;;  %702 = vmatprep.mubr.f32.mxu0 %v293_v34  ;;  %v533_v31 = vld [vmem:[%s2612_s9 + $0x5c8] sm:$0xff]  ;;  %v1729_v37 = vpack.c.bf16 %v530_v29, %v526_v28  ;;  %v571_v28 = vld [vmem:[%s2612_s9 + $0x6f8] sm:$0xff] }
  0xdf   : > { %1024 = vmatprep.mubr.f32.mxu1 %v293_v34  ;;  %1584 = vmatprep.subr.bf16.mxu0 %v1583_v35  ;;  %v1601_v34 = vpack.c.bf16 %v528_v25, %v524_v24  ;;  %v535_v35 = vld [vmem:[%s2612_s9 + $0x5d8] sm:$0xff]  ;;  %v569_v24 = vld [vmem:[%s2612_s9 + $0x6e8] sm:$0xff]  ;;  %v324_v25 = vld [vmem:[%s2602_s26 + $0x140] sm:$0xff] }
  0xe0   : > { %703 = vmatmul.mubr.f32.gmra.mrb[4].mxu0 %v292_v41  ;;  %1712 = vmatprep.subr.bf16.mxu1 %v1711_v38  ;;  %v532_v38 = vld [vmem:[%s2612_s9 + $0x5c0] sm:$0xff]  ;;  %v1731_v44 = vpack.c.bf16 %v539_v36, %v535_v35  ;;  %v570_v35 = vld [vmem:[%s2612_s9 + $0x6f0] sm:$0xff] }
  0xe1   : > { %1025 = vmatmul.mubr.f32.gmra.mrb[4].mxu1 %v292_v41  ;;  %1586 = vmatpush1.bf16.msra.mxu0 %v1585_v42  ;;  %v1603_v41 = vpack.c.bf16 %v537_v32, %v533_v31  ;;  %v534_v42 = vld [vmem:[%s2612_s9 + $0x5d0] sm:$0xff]  ;;  %v568_v31 = vld [vmem:[%s2612_s9 + $0x6e0] sm:$0xff]  ;;  %v329_v32 = vld [vmem:[%s2602_s26 + $0x168] sm:$0xff] }
  0xe2   : > { %1714 = vmatpush1.bf16.msra.mxu1 %v1713_v45  ;;  %708 = vmatprep.mubr.f32.mxu0 %v297_v48  ;;  %v541_v45 = vld [vmem:[%s2612_s9 + $0x608] sm:$0xff]  ;;  %v1733_v51 = vpack.c.bf16 %v538_v43, %v534_v42  ;;  %v579_v42 = vld [vmem:[%s2612_s9 + $0x738] sm:$0xff] }
  0xe3   : > { %1030 = vmatprep.mubr.f32.mxu1 %v297_v48  ;;  %1588 = vmatprep.subr.bf16.mxu0 %v1587_v49  ;;  %v1605_v48 = vpack.c.bf16 %v536_v39, %v532_v38  ;;  %v543_v49 = vld [vmem:[%s2612_s9 + $0x618] sm:$0xff]  ;;  %v577_v38 = vld [vmem:[%s2612_s9 + $0x728] sm:$0xff]  ;;  %v328_v39 = vld [vmem:[%s2602_s26 + $0x160] sm:$0xff] }
  0xe4   : > { %709 = vmatmul.mubr.f32.gmra.mrb[6].mxu0 %v296_v55  ;;  %1716 = vmatprep.subr.bf16.mxu1 %v1715_v52  ;;  %v540_v52 = vld [vmem:[%s2612_s9 + $0x600] sm:$0xff]  ;;  %v1735_v58 = vpack.c.bf16 %v547_v50, %v543_v49  ;;  %v578_v49 = vld [vmem:[%s2612_s9 + $0x730] sm:$0xff] }
  0xe5   : > { %1031 = vmatmul.mubr.f32.gmra.mrb[6].mxu1 %v296_v55  ;;  %1590 = vmatpush1.bf16.msra.mxu0 %v1589_v56  ;;  %v1607_v55 = vpack.c.bf16 %v545_v46, %v541_v45  ;;  %v542_v56 = vld [vmem:[%s2612_s9 + $0x610] sm:$0xff]  ;;  %v576_v45 = vld [vmem:[%s2612_s9 + $0x720] sm:$0xff]  ;;  %v333_v46 = vld [vmem:[%s2602_s26 + $0x188] sm:$0xff] }
  0xe6   : > { %1718 = vmatpush1.bf16.msra.mxu1 %v1717_v59  ;;  %714 = vmatprep.mubr.f32.mxu0 %v301_v62  ;;  %v549_v59 = vld [vmem:[%s2612_s9 + $0x648] sm:$0xff]  ;;  %v1737_v1 = vpack.c.bf16 %v546_v57, %v542_v56  ;;  %v587_v56 = vld [vmem:[%s2612_s9 + $0x778] sm:$0xff] }
  0xe7   : > { %1036 = vmatprep.mubr.f32.mxu1 %v301_v62  ;;  %1592 = vmatprep.subr.bf16.mxu0 %v1591_v63  ;;  %v1609_v62 = vpack.c.bf16 %v544_v53, %v540_v52  ;;  %v551_v63 = vld [vmem:[%s2612_s9 + $0x658] sm:$0xff]  ;;  %v585_v52 = vld [vmem:[%s2612_s9 + $0x768] sm:$0xff]  ;;  %v332_v53 = vld [vmem:[%s2602_s26 + $0x180] sm:$0xff] }
  0xe8   : > { %715 = vmatmul.mubr.f32.gmra.mrb[8].mxu0 %v300_v5  ;;  %1720 = vmatprep.subr.bf16.mxu1 %v1719_v2  ;;  %v548_v2 = vld [vmem:[%s2612_s9 + $0x640] sm:$0xff]  ;;  %v1739_v8 = vpack.c.bf16 %v555_v0, %v551_v63  ;;  %v586_v63 = vld [vmem:[%s2612_s9 + $0x770] sm:$0xff] }
  0xe9   : > { %1037 = vmatmul.mubr.f32.gmra.mrb[8].mxu1 %v300_v5  ;;  %1594 = vmatpush1.bf16.msra.mxu0 %v1593_v6  ;;  %v1611_v5 = vpack.c.bf16 %v553_v60, %v549_v59  ;;  %v550_v6 = vld [vmem:[%s2612_s9 + $0x650] sm:$0xff]  ;;  %v584_v59 = vld [vmem:[%s2612_s9 + $0x760] sm:$0xff]  ;;  %v337_v60 = vld [vmem:[%s2602_s26 + $0x1a8] sm:$0xff] }
  0xea   : > { %1722 = vmatpush1.bf16.msra.mxu1 %v1721_v9  ;;  %720 = vmatprep.mubr.f32.mxu0 %v305_v12  ;;  %v557_v9 = vld [vmem:[%s2612_s9 + $0x688] sm:$0xff]  ;;  %v1741_v15 = vpack.c.bf16 %v554_v7, %v550_v6  ;;  %v595_v6 = vld [vmem:[%s2612_s9 + $0x7b8] sm:$0xff] }
  0xeb   : > { %1042 = vmatprep.mubr.f32.mxu1 %v305_v12  ;;  %1596 = vmatprep.subr.bf16.mxu0 %v1595_v13  ;;  %v1613_v12 = vpack.c.bf16 %v552_v3, %v548_v2  ;;  %v559_v13 = vld [vmem:[%s2612_s9 + $0x698] sm:$0xff]  ;;  %v593_v2 = vld [vmem:[%s2612_s9 + $0x7a8] sm:$0xff]  ;;  %v336_v3 = vld [vmem:[%s2602_s26 + $0x1a0] sm:$0xff] }
  0xec   : > { %721 = vmatmul.mubr.f32.gmra.mrb[10].mxu0 %v304_v19  ;;  %1724 = vmatprep.subr.bf16.mxu1 %v1723_v16  ;;  %v556_v16 = vld [vmem:[%s2612_s9 + $0x680] sm:$0xff]  ;;  %v1743_v22 = vpack.c.bf16 %v563_v14, %v559_v13  ;;  %v594_v13 = vld [vmem:[%s2612_s9 + $0x7b0] sm:$0xff] }
  0xed   : > { %1043 = vmatmul.mubr.f32.gmra.mrb[10].mxu1 %v304_v19  ;;  %1598 = vmatpush1.bf16.msra.mxu0 %v1597_v20  ;;  %v1615_v19 = vpack.c.bf16 %v561_v10, %v557_v9  ;;  %v558_v20 = vld [vmem:[%s2612_s9 + $0x690] sm:$0xff]  ;;  %v592_v9 = vld [vmem:[%s2612_s9 + $0x7a0] sm:$0xff]  ;;  %v341_v10 = vld [vmem:[%s2602_s26 + $0x1c8] sm:$0xff] }
  0xee   : > { %1726 = vmatpush1.bf16.msra.mxu1 %v1725_v23  ;;  %726 = vmatprep.mubr.f32.mxu0 %v309_v26  ;;  %v565_v23 = vld [vmem:[%s2612_s9 + $0x6c8] sm:$0xff]  ;;  %v1745_v29 = vpack.c.bf16 %v562_v21, %v558_v20  ;;  %v603_v20 = vld [vmem:[%s2612_s9 + $0x7f8] sm:$0xff] }
  0xef   : > { %1048 = vmatprep.mubr.f32.mxu1 %v309_v26  ;;  %1600 = vmatprep.subr.bf16.mxu0 %v1599_v27  ;;  %v1617_v26 = vpack.c.bf16 %v560_v17, %v556_v16  ;;  %v567_v27 = vld [vmem:[%s2612_s9 + $0x6d8] sm:$0xff]  ;;  %v601_v16 = vld [vmem:[%s2612_s9 + $0x7e8] sm:$0xff]  ;;  %v340_v17 = vld [vmem:[%s2602_s26 + $0x1c0] sm:$0xff] }
  0xf0   : > { %727 = vmatmul.mubr.f32.gmra.mrb[12].mxu0 %v308_v33  ;;  %1728 = vmatprep.subr.bf16.mxu1 %v1727_v30  ;;  %v564_v30 = vld [vmem:[%s2612_s9 + $0x6c0] sm:$0xff]  ;;  %v1747_v36 = vpack.c.bf16 %v571_v28, %v567_v27  ;;  %v602_v27 = vld [vmem:[%s2612_s9 + $0x7f0] sm:$0xff] }
  0xf1   : > { %1049 = vmatmul.mubr.f32.gmra.mrb[12].mxu1 %v308_v33  ;;  %1602 = vmatpush1.bf16.msra.mxu0 %v1601_v34  ;;  %v1619_v33 = vpack.c.bf16 %v569_v24, %v565_v23  ;;  %v566_v34 = vld [vmem:[%s2612_s9 + $0x6d0] sm:$0xff]  ;;  %v600_v23 = vld [vmem:[%s2612_s9 + $0x7e0] sm:$0xff]  ;;  %v345_v24 = vld [vmem:[%s2602_s26 + $0x1e8] sm:$0xff] }
  0xf2   : > { %1730 = vmatpush1.bf16.msra.mxu1 %v1729_v37  ;;  %732 = vmatprep.mubr.f32.mxu0 %v313_v40  ;;  %v573_v37 = vld [vmem:[%s2612_s9 + $0x708] sm:$0xff]  ;;  %v1749_v43 = vpack.c.bf16 %v570_v35, %v566_v34  ;;  %v291_v34 = vld [vmem:[%s2602_s26 + $0x38] sm:$0xff]  ;;  %v290_v35 = vld [vmem:[%s2602_s26 + $0x30] sm:$0xff] }
  0xf3   : > { %1054 = vmatprep.mubr.f32.mxu1 %v313_v40  ;;  %1604 = vmatprep.subr.bf16.mxu0 %v1603_v41  ;;  %v1621_v40 = vpack.c.bf16 %v568_v31, %v564_v30  ;;  %v575_v41 = vld [vmem:[%s2612_s9 + $0x718] sm:$0xff] }
  0xf4   : > { %733 = vmatmul.mubr.f32.gmra.mrb[14].mxu0 %v312_v47  ;;  %1732 = vmatprep.subr.bf16.mxu1 %v1731_v44  ;;  %v572_v44 = vld [vmem:[%s2612_s9 + $0x700] sm:$0xff]  ;;  %v1751_v50 = vpack.c.bf16 %v579_v42, %v575_v41  ;;  %v302_v41 = vld [vmem:[%s2602_s26 + $0x90] sm:$0xff]  ;;  %v307_v42 = vld [vmem:[%s2602_s26 + $0xb8] sm:$0xff] }
  0xf5   : > { %1055 = vmatmul.mubr.f32.gmra.mrb[14].mxu1 %v312_v47  ;;  %1606 = vmatpush1.bf16.msra.mxu0 %v1605_v48  ;;  %v1623_v47 = vpack.c.bf16 %v577_v38, %v573_v37  ;;  %v574_v48 = vld [vmem:[%s2612_s9 + $0x710] sm:$0xff]  ;;  %v299_v38 = vld [vmem:[%s2602_s26 + $0x78] sm:$0xff] }
  0xf6   : > { %1734 = vmatpush1.bf16.msra.mxu1 %v1733_v51  ;;  %738 = vmatprep.mubr.f32.mxu0 %v317_v54  ;;  %v581_v51 = vld [vmem:[%s2612_s9 + $0x748] sm:$0xff]  ;;  %v1753_v57 = vpack.c.bf16 %v578_v49, %v574_v48  ;;  %v294_v37 = vld [vmem:[%s2602_s26 + $0x50] sm:$0xff]  ;;  %v319_v48 = vld [vmem:[%s2602_s26 + $0x118] sm:$0xff] }
  0xf7   : > { %1060 = vmatprep.mubr.f32.mxu1 %v317_v54  ;;  %1608 = vmatprep.subr.bf16.mxu0 %v1607_v55  ;;  %v1625_v54 = vpack.c.bf16 %v576_v45, %v572_v44  ;;  %v583_v55 = vld [vmem:[%s2612_s9 + $0x758] sm:$0xff]  ;;  %v310_v45 = vld [vmem:[%s2602_s26 + $0xd0] sm:$0xff] }
  0xf8   : > { %739 = vmatmul.mubr.f32.gmra.mrb[16].mxu0 %v316_v61  ;;  %1736 = vmatprep.subr.bf16.mxu1 %v1735_v58  ;;  %v580_v58 = vld [vmem:[%s2612_s9 + $0x740] sm:$0xff]  ;;  %v1755_v0 = vpack.c.bf16 %v587_v56, %v583_v55  ;;  %v311_v44 = vld [vmem:[%s2602_s26 + $0xd8] sm:$0xff]  ;;  %v318_v49 = vld [vmem:[%s2602_s26 + $0x110] sm:$0xff] }
  0xf9   : > { %1061 = vmatmul.mubr.f32.gmra.mrb[16].mxu1 %v316_v61  ;;  %1610 = vmatpush1.bf16.msra.mxu0 %v1609_v62  ;;  %v1627_v61 = vpack.c.bf16 %v585_v52, %v581_v51  ;;  %v582_v62 = vld [vmem:[%s2612_s9 + $0x750] sm:$0xff]  ;;  %v327_v52 = vld [vmem:[%s2602_s26 + $0x158] sm:$0xff] }
  0xfa   : > { %1738 = vmatpush1.bf16.msra.mxu1 %v1737_v1  ;;  %744 = vmatprep.mubr.f32.mxu0 %v321_v4  ;;  %v589_v1 = vld [vmem:[%s2612_s9 + $0x788] sm:$0xff]  ;;  %v1757_v7 = vpack.c.bf16 %v586_v63, %v582_v62  ;;  %v322_v51 = vld [vmem:[%s2602_s26 + $0x130] sm:$0xff]  ;;  %v335_v56 = vld [vmem:[%s2602_s26 + $0x198] sm:$0xff] }
  0xfb   : > { %1066 = vmatprep.mubr.f32.mxu1 %v321_v4  ;;  %1612 = vmatprep.subr.bf16.mxu0 %v1611_v5  ;;  %v1629_v4 = vpack.c.bf16 %v584_v59, %v580_v58  ;;  %v591_v5 = vld [vmem:[%s2612_s9 + $0x798] sm:$0xff]  ;;  %v330_v55 = vld [vmem:[%s2602_s26 + $0x170] sm:$0xff] }
  0xfc   : > { %745 = vmatmul.mubr.f32.gmra.mrb[18].mxu0 %v320_v11  ;;  %1740 = vmatprep.subr.bf16.mxu1 %v1739_v8  ;;  %v588_v8 = vld [vmem:[%s2612_s9 + $0x780] sm:$0xff]  ;;  %v1759_v14 = vpack.c.bf16 %v595_v6, %v591_v5  ;;  %v339_v58 = vld [vmem:[%s2602_s26 + $0x1b8] sm:$0xff]  ;;  %v338_v59 = vld [vmem:[%s2602_s26 + $0x1b0] sm:$0xff] }
  0xfd   : > { %1067 = vmatmul.mubr.f32.gmra.mrb[18].mxu1 %v320_v11  ;;  %1614 = vmatpush1.bf16.msra.mxu0 %v1613_v12  ;;  %v1631_v11 = vpack.c.bf16 %v593_v2, %v589_v1  ;;  %v590_v12 = vld [vmem:[%s2612_s9 + $0x790] sm:$0xff]  ;;  %v347_v62 = vld [vmem:[%s2602_s26 + $0x1f8] sm:$0xff] }
  0xfe   : > { %1742 = vmatpush1.bf16.msra.mxu1 %v1741_v15  ;;  %750 = vmatprep.mubr.f32.mxu0 %v325_v18  ;;  %v597_v15 = vld [vmem:[%s2612_s9 + $0x7c8] sm:$0xff]  ;;  %v1761_v21 = vpack.c.bf16 %v594_v13, %v590_v12  ;;  %v346_v63 = vld [vmem:[%s2602_s26 + $0x1f0] sm:$0xff] }
  0xff   : > { %1072 = vmatprep.mubr.f32.mxu1 %v325_v18  ;;  %1616 = vmatprep.subr.bf16.mxu0 %v1615_v19  ;;  %v1633_v18 = vpack.c.bf16 %v592_v9, %v588_v8  ;;  %v599_v19 = vld [vmem:[%s2612_s9 + $0x7d8] sm:$0xff] }
 0x100   : > { %751 = vmatmul.mubr.f32.gmra.mrb[20].mxu0 %v324_v25  ;;  %1744 = vmatprep.subr.bf16.mxu1 %v1743_v22  ;;  %v596_v22 = vld [vmem:[%s2612_s9 + $0x7c0] sm:$0xff]  ;;  %v1763_v28 = vpack.c.bf16 %v603_v20, %v599_v19 }
 0x101   : > { %1073 = vmatmul.mubr.f32.gmra.mrb[20].mxu1 %v324_v25  ;;  %1618 = vmatpush1.bf16.msra.mxu0 %v1617_v26  ;;  %v1635_v25 = vpack.c.bf16 %v601_v16, %v597_v15  ;;  %v598_v26 = vld [vmem:[%s2612_s9 + $0x7d0] sm:$0xff]  ;;  %v1637_v30 = vpack.c.bf16 %v600_v23, %v596_v22  ;;  %s2134_s9 = scalar_lea.vmem %s2133_s18, 16384 }
 0x102   : > { %1746 = vmatpush1.bf16.msra.mxu1 %v1745_v29  ;;  %756 = vmatprep.mubr.f32.mxu0 %v329_v32  ;;  %v344_v29 = vld [vmem:[%s2602_s26 + $0x1e0] sm:$0xff]  ;;  %v1765_v31 = vpack.c.bf16 %v602_v27, %v598_v26  ;;  %p2136_p9 = scmp.lt.s32.totalorder %s2134_s9, %s2128_s11 }
 0x103   : > { %1078 = vmatprep.mubr.f32.mxu1 %v329_v32  ;;  %1620 = vmatprep.subr.bf16.mxu0 %v1619_v33  ;;  %v287_v32 = vld [vmem:[%s2602_s26 + $0x18] sm:$0xff]  ;;  %v286_v33 = vld [vmem:[%s2602_s26 + $0x10] sm:$0xff] }
 0x104   : > { %757 = vmatmul.mubr.f32.gmra.mrb[22].mxu0 %v328_v39  ;;  %1748 = vmatprep.subr.bf16.mxu1 %v1747_v36  ;;  %v295_v36 = vld [vmem:[%s2602_s26 + $0x58] sm:$0xff]  ;;  %p2137_p4 = por %p2136_p9, %p2135_p3 }
 0x105   : > { %1079 = vmatmul.mubr.f32.gmra.mrb[22].mxu1 %v328_v39  ;;  %1622 = vmatpush1.bf16.msra.mxu0 %v1621_v40  ;;  %v298_v39 = vld [vmem:[%s2602_s26 + $0x70] sm:$0xff]  ;;  %v303_v40 = vld [vmem:[%s2602_s26 + $0x98] sm:$0xff] }
 0x106   : > { %1750 = vmatpush1.bf16.msra.mxu1 %v1749_v43  ;;  %762 = vmatprep.mubr.f32.mxu0 %v333_v46  ;;  %v306_v43 = vld [vmem:[%s2602_s26 + $0xb0] sm:$0xff]  ;;  %p2138_p1 = pnand %p2137_p4, %p2131_p2 }
 0x107   : > { %1084 = vmatprep.mubr.f32.mxu1 %v333_v46  ;;  %1624 = vmatprep.subr.bf16.mxu0 %v1623_v47  ;;  %v315_v46 = vld [vmem:[%s2602_s26 + $0xf8] sm:$0xff]  ;;  %v314_v47 = vld [vmem:[%s2602_s26 + $0xf0] sm:$0xff] }
 0x108   : > { %763 = vmatmul.mubr.f32.gmra.mrb[24].mxu0 %v332_v53  ;;  %1752 = vmatprep.subr.bf16.mxu1 %v1751_v50  ;;  %v323_v50 = vld [vmem:[%s2602_s26 + $0x138] sm:$0xff] }
 0x109   : > { %1085 = vmatmul.mubr.f32.gmra.mrb[24].mxu1 %v332_v53  ;;  %1626 = vmatpush1.bf16.msra.mxu0 %v1625_v54  ;;  %v326_v53 = vld [vmem:[%s2602_s26 + $0x150] sm:$0xff]  ;;  %v331_v54 = vld [vmem:[%s2602_s26 + $0x178] sm:$0xff] }
 0x10a   : > { %1754 = vmatpush1.bf16.msra.mxu1 %v1753_v57  ;;  %768 = vmatprep.mubr.f32.mxu0 %v337_v60  ;;  %v334_v57 = vld [vmem:[%s2602_s26 + $0x190] sm:$0xff] }
 0x10b   : > { %1090 = vmatprep.mubr.f32.mxu1 %v337_v60  ;;  %1628 = vmatprep.subr.bf16.mxu0 %v1627_v61  ;;  %v343_v60 = vld [vmem:[%s2602_s26 + $0x1d8] sm:$0xff]  ;;  %v342_v61 = vld [vmem:[%s2602_s26 + $0x1d0] sm:$0xff]  ;;  %s3230_s26 = smov %s3229_s23 }
 0x10c   : > { %769 = vmatmul.mubr.f32.gmra.mrb[26].mxu0 %v336_v3  ;;  %1756 = vmatprep.subr.bf16.mxu1 %v1755_v0  ;;  %v606_v0 = vlaneseq }
 0x10d   : > { %1091 = vmatmul.mubr.f32.gmra.mrb[26].mxu1 %v336_v3  ;;  %1630 = vmatpush1.bf16.msra.mxu0 %v1629_v4  ;;  %v604_v3 = vld [vmem:[%s246_s27] sm:$0xf] }
 0x10e   : > { %1758 = vmatpush1.bf16.msra.mxu1 %v1757_v7  ;;  %774 = vmatprep.mubr.f32.mxu0 %v341_v10  ;;  %v607_v1 = vshrl.u32 %v606_v0, 7 }
 0x10f   : > { %1096 = vmatprep.mubr.f32.mxu1 %v341_v10  ;;  %1632 = vmatprep.subr.bf16.mxu0 %v1631_v11 }
 0x110   : > { %775 = vmatmul.mubr.f32.gmra.mrb[28].mxu0 %v340_v17  ;;  %1760 = vmatprep.subr.bf16.mxu1 %v1759_v14  ;;  %v608_v2 = vsub.s32 0, %v607_v1  ;;  %v616_v4 = vsub.s32 2, %v607_v1  ;;  %v612_v5 = vsub.s32 1, %v607_v1  ;;  %v620_v6 = vsub.s32 3, %v607_v1 }
 0x111   : > { %1097 = vmatmul.mubr.f32.gmra.mrb[28].mxu1 %v340_v17  ;;  %1634 = vmatpush1.bf16.msra.mxu0 %v1633_v18 }
 0x112   : > { %1762 = vmatpush1.bf16.msra.mxu1 %v1761_v21  ;;  %780 = vmatprep.mubr.f32.mxu0 %v345_v24  ;;  %v2943_v7 = vrot.slane %v604_v3, %v608_v2  ;;  %v2945_v8 = vrot.slane %v604_v3, %v616_v4  ;;  %v2947_v9 = vrot.slane %v604_v3, %v612_v5 }
 0x113   : > { %1102 = vmatprep.mubr.f32.mxu1 %v345_v24  ;;  %1636 = vmatprep.subr.bf16.mxu0 %v1635_v25  ;;  %v2949_v10 = vrot.slane %v604_v3, %v620_v6 }
 0x114   : > { %781 = vmatmul.mubr.f32.gmra.mrb[30].mxu0 %v344_v29  ;;  %1764 = vmatprep.subr.bf16.mxu1 %v1763_v28 }
 0x115   : > { %1103 = vmatmul.mubr.f32.gmra.mrb[30].mxu1 %v344_v29  ;;  %1638 = vmatpush1.bf16.msra.mxu0 %v1637_v30 }
 0x116   : > { %1766 = vmatpush1.bf16.msra.mxu1 %v1765_v31  ;;  %851 = vmatprep.mubr.f32.mxu0 %v287_v32 }
 0x117   : > { %1173 = vmatprep.mubr.f32.mxu1 %v287_v32 }
 0x118   : > { %852 = vmatmul.mubr.f32.vlgmr.msra.gmra.mrb[0].mxu0 %v286_v33 }
 0x119   : > { %1174 = vmatmul.mubr.f32.vlgmr.msra.gmra.mrb[0].mxu1 %v286_v33  ;;  %857 = vmatprep.mubr.f32.mxu0 %v291_v34 }
 0x11a   : > { %1179 = vmatprep.mubr.f32.mxu1 %v291_v34 }
 0x11c   : > { %858 = vmatmul.mubr.f32.gmra.mrb[2].mxu0 %v290_v35 }
 0x11d   : > { %1180 = vmatmul.mubr.f32.gmra.mrb[2].mxu1 %v290_v35  ;;  %863 = vmatprep.mubr.f32.mxu0 %v295_v36 }
 0x11e   : > { %1185 = vmatprep.mubr.f32.mxu1 %v295_v36 }
 0x120   : > { %864 = vmatmul.mubr.f32.gmra.mrb[4].mxu0 %v294_v37 }
 0x121   : > { %1186 = vmatmul.mubr.f32.gmra.mrb[4].mxu1 %v294_v37  ;;  %869 = vmatprep.mubr.f32.mxu0 %v299_v38 }
 0x122   : > { %1191 = vmatprep.mubr.f32.mxu1 %v299_v38 }
 0x124   : > { %870 = vmatmul.mubr.f32.gmra.mrb[6].mxu0 %v298_v39 }
 0x125   : > { %1192 = vmatmul.mubr.f32.gmra.mrb[6].mxu1 %v298_v39  ;;  %875 = vmatprep.mubr.f32.mxu0 %v303_v40 }
 0x126   : > { %1197 = vmatprep.mubr.f32.mxu1 %v303_v40 }
 0x128   : > { %876 = vmatmul.mubr.f32.gmra.mrb[8].mxu0 %v302_v41 }
 0x129   : > { %1198 = vmatmul.mubr.f32.gmra.mrb[8].mxu1 %v302_v41  ;;  %881 = vmatprep.mubr.f32.mxu0 %v307_v42 }
 0x12a   : > { %1203 = vmatprep.mubr.f32.mxu1 %v307_v42 }
 0x12c   : > { %882 = vmatmul.mubr.f32.gmra.mrb[10].mxu0 %v306_v43 }
 0x12d   : > { %1204 = vmatmul.mubr.f32.gmra.mrb[10].mxu1 %v306_v43  ;;  %887 = vmatprep.mubr.f32.mxu0 %v311_v44 }
 0x12e   : > { %1209 = vmatprep.mubr.f32.mxu1 %v311_v44 }
 0x130   : > { %888 = vmatmul.mubr.f32.gmra.mrb[12].mxu0 %v310_v45 }
 0x131   : > { %1210 = vmatmul.mubr.f32.gmra.mrb[12].mxu1 %v310_v45  ;;  %893 = vmatprep.mubr.f32.mxu0 %v315_v46 }
 0x132   : > { %1215 = vmatprep.mubr.f32.mxu1 %v315_v46 }
 0x134   : > { %894 = vmatmul.mubr.f32.gmra.mrb[14].mxu0 %v314_v47 }
 0x135   : > { %1216 = vmatmul.mubr.f32.gmra.mrb[14].mxu1 %v314_v47  ;;  %899 = vmatprep.mubr.f32.mxu0 %v319_v48 }
 0x136   : > { %1221 = vmatprep.mubr.f32.mxu1 %v319_v48 }
 0x138   : > { %900 = vmatmul.mubr.f32.gmra.mrb[16].mxu0 %v318_v49 }
 0x139   : > { %1222 = vmatmul.mubr.f32.gmra.mrb[16].mxu1 %v318_v49  ;;  %905 = vmatprep.mubr.f32.mxu0 %v323_v50 }
 0x13a   : > { %1227 = vmatprep.mubr.f32.mxu1 %v323_v50 }
 0x13c   : > { %906 = vmatmul.mubr.f32.gmra.mrb[18].mxu0 %v322_v51 }
 0x13d   : > { %1228 = vmatmul.mubr.f32.gmra.mrb[18].mxu1 %v322_v51  ;;  %911 = vmatprep.mubr.f32.mxu0 %v327_v52 }
 0x13e   : > { %1233 = vmatprep.mubr.f32.mxu1 %v327_v52 }
 0x140   : > { %912 = vmatmul.mubr.f32.gmra.mrb[20].mxu0 %v326_v53 }
 0x141   : > { %1234 = vmatmul.mubr.f32.gmra.mrb[20].mxu1 %v326_v53  ;;  %917 = vmatprep.mubr.f32.mxu0 %v331_v54 }
 0x142   : > { %1239 = vmatprep.mubr.f32.mxu1 %v331_v54 }
 0x144   : > { %918 = vmatmul.mubr.f32.gmra.mrb[22].mxu0 %v330_v55 }
 0x145   : > { %1240 = vmatmul.mubr.f32.gmra.mrb[22].mxu1 %v330_v55  ;;  %923 = vmatprep.mubr.f32.mxu0 %v335_v56 }
 0x146   : > { %1245 = vmatprep.mubr.f32.mxu1 %v335_v56 }
 0x148   : > { %924 = vmatmul.mubr.f32.gmra.mrb[24].mxu0 %v334_v57 }
 0x149   : > { %1246 = vmatmul.mubr.f32.gmra.mrb[24].mxu1 %v334_v57  ;;  %929 = vmatprep.mubr.f32.mxu0 %v339_v58 }
 0x14a   : > { %1251 = vmatprep.mubr.f32.mxu1 %v339_v58 }
 0x14c   : > { %930 = vmatmul.mubr.f32.gmra.mrb[26].mxu0 %v338_v59 }
 0x14d   : > { %1252 = vmatmul.mubr.f32.gmra.mrb[26].mxu1 %v338_v59  ;;  %935 = vmatprep.mubr.f32.mxu0 %v343_v60 }
 0x14e   : > { %1257 = vmatprep.mubr.f32.mxu1 %v343_v60 }
 0x150   : > { %936 = vmatmul.mubr.f32.gmra.mrb[28].mxu0 %v342_v61 }
 0x151   : > { %1258 = vmatmul.mubr.f32.gmra.mrb[28].mxu1 %v342_v61  ;;  %941 = vmatprep.mubr.f32.mxu0 %v347_v62 }
 0x152   : > { %1263 = vmatprep.mubr.f32.mxu1 %v347_v62 }
 0x154   : > { %942 = vmatmul.mubr.f32.gmra.mrb[30].mxu0 %v346_v63 }
 0x155   : > { %1264 = vmatmul.mubr.f32.gmra.mrb[30].mxu1 %v346_v63 }
 0x1eb   : > { %v853_v11 = vpop.f32.mrb[0].mxu0 }
 0x1ec   : > { %v1767_v12 = vadd.f32 %v853_v11, %v2943_v7  ;;  %v1175_v13 = vpop.f32.mrb[0].mxu1  ;;  %v855_v14 = vpop.f32.mrb[1].mxu0 }
 0x1ed   : > { %v1799_v15 = vadd.f32 %v1175_v13, %v2945_v8  ;;  %v1768_v16 = vadd.f32 %v855_v14, %v2947_v9  ;;  %v1177_v17 = vpop.f32.mrb[1].mxu1 }
 0x1ee   : > { %1270 = vst [vmem:[%s2954_s6] sm:$0xff] %v1767_v12  ;;  %v1800_v18 = vadd.f32 %v1177_v17, %v2949_v10 }
 0x1ef   : > { %1272 = vst [vmem:[%s2954_s6 + $0x10] sm:$0xff] %v1799_v15  ;;  %1271 = vst [vmem:[%s2954_s6 + $0x8] sm:$0xff] %v1768_v16  ;;  %v859_v19 = vpop.f32.mrb[2].mxu0 }
 0x1f0   : > { %1273 = vst [vmem:[%s2954_s6 + $0x18] sm:$0xff] %v1800_v18  ;;  %v1769_v20 = vadd.f32 %v859_v19, %v2943_v7  ;;  %v1181_v21 = vpop.f32.mrb[2].mxu1  ;;  %v861_v22 = vpop.f32.mrb[3].mxu0 }
 0x1f1   : > { %v1801_v23 = vadd.f32 %v1181_v21, %v2945_v8  ;;  %v1770_v24 = vadd.f32 %v861_v22, %v2947_v9  ;;  %v1183_v25 = vpop.f32.mrb[3].mxu1 }
 0x1f2   : > { %1274 = vst [vmem:[%s2954_s6 + $0x20] sm:$0xff] %v1769_v20  ;;  %v1802_v26 = vadd.f32 %v1183_v25, %v2949_v10 }
 0x1f3   : > { %1276 = vst [vmem:[%s2954_s6 + $0x30] sm:$0xff] %v1801_v23  ;;  %1275 = vst [vmem:[%s2954_s6 + $0x28] sm:$0xff] %v1770_v24  ;;  %v865_v27 = vpop.f32.mrb[4].mxu0 }
 0x1f4   : > { %1277 = vst [vmem:[%s2954_s6 + $0x38] sm:$0xff] %v1802_v26  ;;  %v1771_v28 = vadd.f32 %v865_v27, %v2943_v7  ;;  %v1187_v29 = vpop.f32.mrb[4].mxu1  ;;  %v867_v30 = vpop.f32.mrb[5].mxu0 }
 0x1f5   : > { %v1803_v31 = vadd.f32 %v1187_v29, %v2945_v8  ;;  %v1772_v32 = vadd.f32 %v867_v30, %v2947_v9  ;;  %v1189_v33 = vpop.f32.mrb[5].mxu1 }
 0x1f6   : > { %1278 = vst [vmem:[%s2954_s6 + $0x40] sm:$0xff] %v1771_v28  ;;  %v1804_v34 = vadd.f32 %v1189_v33, %v2949_v10 }
 0x1f7   : > { %1280 = vst [vmem:[%s2954_s6 + $0x50] sm:$0xff] %v1803_v31  ;;  %1279 = vst [vmem:[%s2954_s6 + $0x48] sm:$0xff] %v1772_v32  ;;  %v871_v35 = vpop.f32.mrb[6].mxu0 }
 0x1f8   : > { %1281 = vst [vmem:[%s2954_s6 + $0x58] sm:$0xff] %v1804_v34  ;;  %v1773_v36 = vadd.f32 %v871_v35, %v2943_v7  ;;  %v1193_v37 = vpop.f32.mrb[6].mxu1  ;;  %v873_v38 = vpop.f32.mrb[7].mxu0 }
 0x1f9   : > { %v1805_v39 = vadd.f32 %v1193_v37, %v2945_v8  ;;  %v1774_v40 = vadd.f32 %v873_v38, %v2947_v9  ;;  %v1195_v41 = vpop.f32.mrb[7].mxu1 }
 0x1fa   : > { %1282 = vst [vmem:[%s2954_s6 + $0x60] sm:$0xff] %v1773_v36  ;;  %v1806_v42 = vadd.f32 %v1195_v41, %v2949_v10 }
 0x1fb   : > { %1284 = vst [vmem:[%s2954_s6 + $0x70] sm:$0xff] %v1805_v39  ;;  %1283 = vst [vmem:[%s2954_s6 + $0x68] sm:$0xff] %v1774_v40  ;;  %v877_v43 = vpop.f32.mrb[8].mxu0 }
 0x1fc   : > { %1285 = vst [vmem:[%s2954_s6 + $0x78] sm:$0xff] %v1806_v42  ;;  %v1775_v44 = vadd.f32 %v877_v43, %v2943_v7  ;;  %v1199_v45 = vpop.f32.mrb[8].mxu1  ;;  %v879_v46 = vpop.f32.mrb[9].mxu0 }
 0x1fd   : > { %v1807_v47 = vadd.f32 %v1199_v45, %v2945_v8  ;;  %v1776_v48 = vadd.f32 %v879_v46, %v2947_v9  ;;  %v1201_v49 = vpop.f32.mrb[9].mxu1 }
 0x1fe   : > { %1286 = vst [vmem:[%s2954_s6 + $0x80] sm:$0xff] %v1775_v44  ;;  %v1808_v50 = vadd.f32 %v1201_v49, %v2949_v10 }
 0x1ff   : > { %1288 = vst [vmem:[%s2954_s6 + $0x90] sm:$0xff] %v1807_v47  ;;  %1287 = vst [vmem:[%s2954_s6 + $0x88] sm:$0xff] %v1776_v48  ;;  %v883_v51 = vpop.f32.mrb[10].mxu0 }
 0x200   : > { %1289 = vst [vmem:[%s2954_s6 + $0x98] sm:$0xff] %v1808_v50  ;;  %v1777_v52 = vadd.f32 %v883_v51, %v2943_v7  ;;  %v1205_v53 = vpop.f32.mrb[10].mxu1  ;;  %v885_v54 = vpop.f32.mrb[11].mxu0 }
 0x201   : > { %v1809_v55 = vadd.f32 %v1205_v53, %v2945_v8  ;;  %v1778_v56 = vadd.f32 %v885_v54, %v2947_v9  ;;  %v1207_v57 = vpop.f32.mrb[11].mxu1 }
 0x202   : > { %1290 = vst [vmem:[%s2954_s6 + $0xa0] sm:$0xff] %v1777_v52  ;;  %v1810_v58 = vadd.f32 %v1207_v57, %v2949_v10 }
 0x203   : > { %1292 = vst [vmem:[%s2954_s6 + $0xb0] sm:$0xff] %v1809_v55  ;;  %1291 = vst [vmem:[%s2954_s6 + $0xa8] sm:$0xff] %v1778_v56  ;;  %v889_v59 = vpop.f32.mrb[12].mxu0 }
 0x204   : > { %1293 = vst [vmem:[%s2954_s6 + $0xb8] sm:$0xff] %v1810_v58  ;;  %v1779_v60 = vadd.f32 %v889_v59, %v2943_v7  ;;  %v1211_v61 = vpop.f32.mrb[12].mxu1  ;;  %v891_v62 = vpop.f32.mrb[13].mxu0 }
 0x205   : > { %v1811_v63 = vadd.f32 %v1211_v61, %v2945_v8  ;;  %v1780_v0 = vadd.f32 %v891_v62, %v2947_v9  ;;  %v1213_v1 = vpop.f32.mrb[13].mxu1 }
 0x206   : > { %1294 = vst [vmem:[%s2954_s6 + $0xc0] sm:$0xff] %v1779_v60  ;;  %v1812_v2 = vadd.f32 %v1213_v1, %v2949_v10 }
 0x207   : > { %1296 = vst [vmem:[%s2954_s6 + $0xd0] sm:$0xff] %v1811_v63  ;;  %1295 = vst [vmem:[%s2954_s6 + $0xc8] sm:$0xff] %v1780_v0  ;;  %v895_v3 = vpop.f32.mrb[14].mxu0 }
 0x208   : > { %1297 = vst [vmem:[%s2954_s6 + $0xd8] sm:$0xff] %v1812_v2  ;;  %v1781_v4 = vadd.f32 %v895_v3, %v2943_v7  ;;  %v1217_v5 = vpop.f32.mrb[14].mxu1  ;;  %v897_v6 = vpop.f32.mrb[15].mxu0 }
 0x209   : > { %v1813_v11 = vadd.f32 %v1217_v5, %v2945_v8  ;;  %v1782_v12 = vadd.f32 %v897_v6, %v2947_v9  ;;  %v1219_v13 = vpop.f32.mrb[15].mxu1 }
 0x20a   : > { %1298 = vst [vmem:[%s2954_s6 + $0xe0] sm:$0xff] %v1781_v4  ;;  %v1814_v14 = vadd.f32 %v1219_v13, %v2949_v10 }
 0x20b   : > { %1300 = vst [vmem:[%s2954_s6 + $0xf0] sm:$0xff] %v1813_v11  ;;  %1299 = vst [vmem:[%s2954_s6 + $0xe8] sm:$0xff] %v1782_v12  ;;  %v901_v15 = vpop.f32.mrb[16].mxu0 }
 0x20c   : > { %1301 = vst [vmem:[%s2954_s6 + $0xf8] sm:$0xff] %v1814_v14  ;;  %v1783_v16 = vadd.f32 %v901_v15, %v2943_v7  ;;  %v1223_v17 = vpop.f32.mrb[16].mxu1  ;;  %v903_v18 = vpop.f32.mrb[17].mxu0 }
 0x20d   : > { %v1815_v19 = vadd.f32 %v1223_v17, %v2945_v8  ;;  %v1784_v20 = vadd.f32 %v903_v18, %v2947_v9  ;;  %v1225_v21 = vpop.f32.mrb[17].mxu1 }
 0x20e   : > { %1302 = vst [vmem:[%s2954_s6 + $0x100] sm:$0xff] %v1783_v16  ;;  %v1816_v22 = vadd.f32 %v1225_v21, %v2949_v10 }
 0x20f   : > { %1304 = vst [vmem:[%s2954_s6 + $0x110] sm:$0xff] %v1815_v19  ;;  %1303 = vst [vmem:[%s2954_s6 + $0x108] sm:$0xff] %v1784_v20  ;;  %v907_v23 = vpop.f32.mrb[18].mxu0 }
 0x210   : > { %1305 = vst [vmem:[%s2954_s6 + $0x118] sm:$0xff] %v1816_v22  ;;  %v1785_v24 = vadd.f32 %v907_v23, %v2943_v7  ;;  %v1229_v25 = vpop.f32.mrb[18].mxu1  ;;  %v909_v26 = vpop.f32.mrb[19].mxu0 }
 0x211   : > { %v1817_v27 = vadd.f32 %v1229_v25, %v2945_v8  ;;  %v1786_v28 = vadd.f32 %v909_v26, %v2947_v9  ;;  %v1231_v29 = vpop.f32.mrb[19].mxu1 }
 0x212   : > { %1306 = vst [vmem:[%s2954_s6 + $0x120] sm:$0xff] %v1785_v24  ;;  %v1818_v30 = vadd.f32 %v1231_v29, %v2949_v10 }
 0x213   : > { %1308 = vst [vmem:[%s2954_s6 + $0x130] sm:$0xff] %v1817_v27  ;;  %1307 = vst [vmem:[%s2954_s6 + $0x128] sm:$0xff] %v1786_v28  ;;  %v913_v31 = vpop.f32.mrb[20].mxu0 }
 0x214   : > { %1309 = vst [vmem:[%s2954_s6 + $0x138] sm:$0xff] %v1818_v30  ;;  %v1787_v32 = vadd.f32 %v913_v31, %v2943_v7  ;;  %v1235_v33 = vpop.f32.mrb[20].mxu1  ;;  %v915_v34 = vpop.f32.mrb[21].mxu0 }
 0x215   : > { %v1819_v35 = vadd.f32 %v1235_v33, %v2945_v8  ;;  %v1788_v36 = vadd.f32 %v915_v34, %v2947_v9  ;;  %v1237_v37 = vpop.f32.mrb[21].mxu1 }
 0x216   : > { %1310 = vst [vmem:[%s2954_s6 + $0x140] sm:$0xff] %v1787_v32  ;;  %v1820_v38 = vadd.f32 %v1237_v37, %v2949_v10 }
 0x217   : > { %1312 = vst [vmem:[%s2954_s6 + $0x150] sm:$0xff] %v1819_v35  ;;  %1311 = vst [vmem:[%s2954_s6 + $0x148] sm:$0xff] %v1788_v36  ;;  %v919_v39 = vpop.f32.mrb[22].mxu0 }
 0x218   : > { %1313 = vst [vmem:[%s2954_s6 + $0x158] sm:$0xff] %v1820_v38  ;;  %v1789_v40 = vadd.f32 %v919_v39, %v2943_v7  ;;  %v1241_v41 = vpop.f32.mrb[22].mxu1  ;;  %v921_v42 = vpop.f32.mrb[23].mxu0 }
 0x219   : > { %v1821_v43 = vadd.f32 %v1241_v41, %v2945_v8  ;;  %v1790_v44 = vadd.f32 %v921_v42, %v2947_v9  ;;  %v1243_v45 = vpop.f32.mrb[23].mxu1 }
 0x21a   : > { %1314 = vst [vmem:[%s2954_s6 + $0x160] sm:$0xff] %v1789_v40  ;;  %v1822_v46 = vadd.f32 %v1243_v45, %v2949_v10 }
 0x21b   : > { %1316 = vst [vmem:[%s2954_s6 + $0x170] sm:$0xff] %v1821_v43  ;;  %1315 = vst [vmem:[%s2954_s6 + $0x168] sm:$0xff] %v1790_v44  ;;  %v925_v47 = vpop.f32.mrb[24].mxu0 }
 0x21c   : > { %1317 = vst [vmem:[%s2954_s6 + $0x178] sm:$0xff] %v1822_v46  ;;  %v1791_v48 = vadd.f32 %v925_v47, %v2943_v7  ;;  %v1247_v49 = vpop.f32.mrb[24].mxu1  ;;  %v927_v50 = vpop.f32.mrb[25].mxu0 }
 0x21d   : > { %v1823_v51 = vadd.f32 %v1247_v49, %v2945_v8  ;;  %v1792_v52 = vadd.f32 %v927_v50, %v2947_v9  ;;  %v1249_v53 = vpop.f32.mrb[25].mxu1 }
 0x21e   : > { %1318 = vst [vmem:[%s2954_s6 + $0x180] sm:$0xff] %v1791_v48  ;;  %v1824_v54 = vadd.f32 %v1249_v53, %v2949_v10 }
 0x21f   : > { %1320 = vst [vmem:[%s2954_s6 + $0x190] sm:$0xff] %v1823_v51  ;;  %1319 = vst [vmem:[%s2954_s6 + $0x188] sm:$0xff] %v1792_v52  ;;  %v931_v55 = vpop.f32.mrb[26].mxu0 }
 0x220   : > { %1321 = vst [vmem:[%s2954_s6 + $0x198] sm:$0xff] %v1824_v54  ;;  %v1793_v56 = vadd.f32 %v931_v55, %v2943_v7  ;;  %v1253_v57 = vpop.f32.mrb[26].mxu1  ;;  %v933_v58 = vpop.f32.mrb[27].mxu0 }
 0x221   : > { %v1825_v59 = vadd.f32 %v1253_v57, %v2945_v8  ;;  %v1794_v60 = vadd.f32 %v933_v58, %v2947_v9  ;;  %v1255_v61 = vpop.f32.mrb[27].mxu1 }
 0x222   : > { %1322 = vst [vmem:[%s2954_s6 + $0x1a0] sm:$0xff] %v1793_v56  ;;  %v1826_v62 = vadd.f32 %v1255_v61, %v2949_v10 }
 0x223   : > { %1324 = vst [vmem:[%s2954_s6 + $0x1b0] sm:$0xff] %v1825_v59  ;;  %1323 = vst [vmem:[%s2954_s6 + $0x1a8] sm:$0xff] %v1794_v60  ;;  %v937_v63 = vpop.f32.mrb[28].mxu0 }
 0x224   : > { %1325 = vst [vmem:[%s2954_s6 + $0x1b8] sm:$0xff] %v1826_v62  ;;  %v1795_v0 = vadd.f32 %v937_v63, %v2943_v7  ;;  %v1259_v1 = vpop.f32.mrb[28].mxu1  ;;  %v939_v2 = vpop.f32.mrb[29].mxu0 }
 0x225   : > { %v1827_v3 = vadd.f32 %v1259_v1, %v2945_v8  ;;  %v1796_v4 = vadd.f32 %v939_v2, %v2947_v9  ;;  %v1261_v5 = vpop.f32.mrb[29].mxu1 }
 0x226   : > { %1326 = vst [vmem:[%s2954_s6 + $0x1c0] sm:$0xff] %v1795_v0  ;;  %v1828_v6 = vadd.f32 %v1261_v5, %v2949_v10 }
 0x227   : > { %1328 = vst [vmem:[%s2954_s6 + $0x1d0] sm:$0xff] %v1827_v3  ;;  %1327 = vst [vmem:[%s2954_s6 + $0x1c8] sm:$0xff] %v1796_v4  ;;  %v943_v11 = vpop.f32.mrb[30].mxu0 }
 0x228   : > { %1329 = vst [vmem:[%s2954_s6 + $0x1d8] sm:$0xff] %v1828_v6  ;;  %v1797_v12 = vadd.f32 %v943_v11, %v2943_v7  ;;  %v1265_v13 = vpop.f32.mrb[30].mxu1  ;;  %v945_v14 = vpop.f32.mrb[31].mxu0 }
 0x229   : > { %v1829_v15 = vadd.f32 %v1265_v13, %v2945_v8  ;;  %v1798_v16 = vadd.f32 %v945_v14, %v2947_v9  ;;  %v1267_v17 = vpop.f32.mrb[31].mxu1 }
 0x22a   : > { %1330 = vst [vmem:[%s2954_s6 + $0x1e0] sm:$0xff] %v1797_v12  ;;  %v1830_v7 = vadd.f32 %v1267_v17, %v2949_v10 }
 0x22b   : > { %1332 = vst [vmem:[%s2954_s6 + $0x1f0] sm:$0xff] %v1829_v15  ;;  %1331 = vst [vmem:[%s2954_s6 + $0x1e8] sm:$0xff] %v1798_v16 }
 0x22c   : > { %1333 = vst [vmem:[%s2954_s6 + $0x1f8] sm:$0xff] %v1830_v7 }
 0x22d   : > { %2141 = shalt.err (!%p2138_p1)
}
 0x22e   : > { %s2142_s7 = scalar_lea.hbm %s3080_s15, 8192  ;;  %s2146_s10 = scalar_lea.hbm %s3230_s26, 49152 }
 0x22f   : > { %p2143_p0 = scmp.ne.s32.totalorder %s3080_s15, %s2142_s7  ;;  %p2147_p8 = scmp.lt.u32.totalorder %s3080_s15, %s3230_s26 }
 0x230   : > { %p2148_p10 = scmp.lt.u32.totalorder %s2146_s10, %s2142_s7  ;;  %p2150_p7 = scmp.lt.u32.totalorder %s2142_s7, %s3080_s15 }
 0x231   : > { %p2144_p12 = pnand %p2143_p0, %p3231_p11 }
 0x232   : > { %p2149_p6 = por %p2148_p10, %p2147_p8 }
 0x233   : > { %p2145_p13 = pneg %p2144_p12 }
 0x234   : > { %p2151_p5 = por %p2150_p7, %p2149_p6 }
 0x236   : > { %p2152_p2 = pnand %p2151_p5, %p2145_p13 }
 0x238   : > { %2155 = shalt.err (!%p2152_p2)
}
 0x239   : > { %s2287_s1 = smov 512   ;;  %s2288_s17 = smov 1536  }
 0x23a   : > { %s2289_s22 = smov 32  }
 0x23b   : > { %1902 = dma.vmem_to_hbm [thread:$0]  (%p3231_p11), %s3084_s21, 8192, %s3080_s15, %s3093_s30, %s2287_s1, %s2288_s17, %s2289_s22  }
 0x23c PF: > { %p1919_p3 = scmp.ge.s32.totalorder %s2278_s25, 2  ;;  %s1366_s3 = sand.u32 1, %s2226_s12  }
 0x23d   : > { %p3232_p9 = scmp.ne.s32.totalorder %s3216_s8, 0  ;;  %s1367_s20 = scalar_lea.sflag [#allocation4], %s1366_s3 }
 0x23f   : > { %p1915_p4 = pnand %p1919_p3, %p3232_p9 }
 0x241   : > { %2221 = dma.done.wait (!%p1915_p4), %s1367_s20, 8192  }
 0x242   : > { %2223 = vsyncadd (!%p1915_p4), %s1367_s20, 4294959104  ;;  %s22_s25 = sadd.s32 1, %s2278_s25   ;;  %s3234_s28 = sld [smem:[#allocation12_spill]] }
 0x243   : > { %p3122_p1 = scmp.ge.s32.totalorder %s22_s25, 8   ;;  %s3235_s14 = sld [smem:[#allocation23_spill]] }
 0x244   : > { %s3236_s21 = sld [smem:[#allocation13_spill]]  ;;  %s3237_s17 = sld [smem:[#allocation21_spill]] }
 0x245   : > { %s3238_s23 = sld [smem:[#allocation14_spill]]  ;;  %s3239_s20 = sld [smem:[#allocation22_spill]] }
 0x246   : > { %s3240_s8 = sld [smem:[#allocation17_spill]]  ;;  %s3241_s22 = sld [smem:[#allocation18_spill]] }
 0x247   : > { %s3242_s30 = sld [smem:[#allocation19_spill]]  ;;  %s3243_s24 = sld [smem:[#allocation20_spill]] }
 0x248   : > { %s3244_s12 = smov %s2230_s13  ;;  %s3245_s13 = smov %s3234_s28 }
 0x249   : > { %s3246_s15 = smov %s2242_s16  ;;  %s3248_s18 = smov %s2254_s19 }
 0x24a   : > { %s3247_s16 = smov %s3236_s21  ;;  %21 = sbr.rel (!%p3122_p1) target bundleno = 15 (0xf), region = 101 }
 0x24b   : > { %s3249_s19 = smov %s3238_s23 }
 0x24c   : > { %s3250_s21 = smov %s3240_s8 }
 0x24d   : > { %s3251_s23 = smov %s3242_s30 }
 0x251   :  { %1372 = vsyncpa [#allocation3], 1 }
 0x252   :  { %1374 = vsyncpa [#allocation3 + $0x1], 1 }
 0x253   :  { %1375 = vsyncpa [#allocation6], 1 }
 0x254   :  { %1377 = vsyncpa [#allocation6 + $0x1], 1 }
 0x255   :  { %1378 = vsyncpa [#allocation4], 1 }
 0x256   :  { %1380 = vsyncpa [#allocation4 + $0x1], 1 }

</bundles_post_ra>
